<compile_context>
chip_gen: v7x
topology: tpu7x:2x2x1
jax: 0.10.0
libtpu: 0.0.40
codegen_flags: <defaults>
</compile_context>

<pallas_src>
import functools

import jax
import jax.numpy as jnp
from jax.experimental import pallas as pl
from jax.experimental.pallas import tpu as pltpu  # noqa: F401  (TPU backend)


# ---------------------------------------------------------------------------
# Fused Pallas kernel: 2 GRU layers (time loop inside) + Linear + ReLU
# ---------------------------------------------------------------------------
def gru_net_kernel(gi1_ref,                      # (T, B, 3H) pre-projected layer-1 input gates
                   wh1_ref, bhn1_ref,            # (H, 3H), (1, H)
                   wi2_ref, bi2_ref,             # (H, 3H), (1, 3H)
                   wh2_ref, bhn2_ref,            # (H, 3H), (1, H)
                   wcls_ref, bcls_ref,           # (H, Lpad), (1, Lpad)
                   out_ref):                     # (B, Lpad)
    T, B, G = gi1_ref.shape
    H = G // 3

    # Hoist weight / bias loads out of the (unrolled) time loop.
    wh1 = wh1_ref[...]
    wi2 = wi2_ref[...]
    wh2 = wh2_ref[...]
    bhn1 = bhn1_ref[...]
    bi2 = bi2_ref[...]
    bhn2 = bhn2_ref[...]

    def gru_cell(gi, gh, h, bhn):
        # gi already contains b_ir+b_hr / b_iz+b_hz / b_in per gate block.
        r = jax.nn.sigmoid(gi[:, :H] + gh[:, :H])
        z = jax.nn.sigmoid(gi[:, H:2 * H] + gh[:, H:2 * H])
        n = jnp.tanh(gi[:, 2 * H:] + r * (gh[:, 2 * H:] + bhn))
        return (1.0 - z) * n + z * h

    def step(t, carry):
        h1, h2 = carry

        # ---- layer 1: input projection was hoisted; only h @ W_h here ----
        gi1_t = gi1_ref[t]                                        # (B, 3H)
        gh1 = jnp.dot(h1, wh1, preferred_element_type=jnp.float32)
        h1_new = gru_cell(gi1_t, gh1, h1, bhn1)

        # ---- layer 2: its input is the fresh layer-1 hidden state ----
        gi2 = jnp.dot(h1_new, wi2, preferred_element_type=jnp.float32) + bi2
        gh2 = jnp.dot(h2, wh2, preferred_element_type=jnp.float32)
        h2_new = gru_cell(gi2, gh2, h2, bhn2)

        return (h1_new, h2_new)

    h0 = jnp.zeros((B, H), jnp.float32)
    # Short fixed trip-count: unroll so the LLO scheduler sees the whole chain.
    _, h2_last = jax.lax.fori_loop(0, T, step, (h0, h0), unroll=True)

    # ---- classifier on the last timestep (lane-dense 128-wide output) ----
    logits = jnp.dot(h2_last, wcls_ref[...],
                     preferred_element_type=jnp.float32) + bcls_ref[...]
    out_ref[...] = jnp.maximum(logits, 0.0).astype(out_ref.dtype)


# ---------------------------------------------------------------------------
# Wrapper
# ---------------------------------------------------------------------------
@functools.partial(jax.jit, static_argnames=("num_labels",))
def gru_net_forward(x_btd, kp, *, num_labels):
    """x_btd: (B, T, input_size) -> (B, num_labels)."""
    B, T, D = x_btd.shape
    Lpad = kp["wcls"].shape[1]

    # (B, T, D) -> (T, B, D): time-major for sequential consumption in-kernel.
    x_tbd = jnp.transpose(x_btd, (1, 0, 2))

    # Hoisted layer-1 input projection: one big matmul instead of T tiny ones.
    gi1 = jnp.einsum("tbd,dg->tbg", x_tbd, kp["wi1"]) + kp["bi1"]   # (T, B, 3H)

    logits_pad = pl.pallas_call(
        gru_net_kernel,
        out_shape=jax.ShapeDtypeStruct((B, Lpad), jnp.float32),
    )(gi1,
      kp["wh1"], kp["bhn1"],
      kp["wi2"], kp["bi2"], kp["wh2"], kp["bhn2"],
      kp["wcls"], kp["bcls"])

    return logits_pad[:, :num_labels]


# ---------------------------------------------------------------------------
# Parameter init (mimics PyTorch uniform(-1/sqrt(H), 1/sqrt(H)))
# ---------------------------------------------------------------------------
def init_params(key, input_size, hidden_size, num_labels, num_layers=2):
    assert num_layers == 2, "fused kernel is written for the module default (2 layers)"
    bound = 1.0 / (hidden_size ** 0.5)

    def uniform(k, shape):
        return jax.random.uniform(k, shape, jnp.float32, -bound, bound)

    raw_layers = []
    for layer in range(num_layers):
        d_in = input_size if layer == 0 else hidden_size
        keys = jax.random.split(jax.random.fold_in(key, layer), 12)
        raw_layers.append(dict(
            wir=uniform(keys[0], (d_in, hidden_size)),
            wiz=uniform(keys[1], (d_in, hidden_size)),
            win=uniform(keys[2], (d_in, hidden_size)),
            whr=uniform(keys[3], (hidden_size, hidden_size)),
            whz=uniform(keys[4], (hidden_size, hidden_size)),
            whn=uniform(keys[5], (hidden_size, hidden_size)),
            b_ir=uniform(keys[6], (1, hidden_size)),
            b_iz=uniform(keys[7], (1, hidden_size)),
            b_in=uniform(keys[8], (1, hidden_size)),
            b_hr=uniform(keys[9], (1, hidden_size)),
            b_hz=uniform(keys[10], (1, hidden_size)),
            b_hn=uniform(keys[11], (1, hidden_size)),
        ))

    kc_w, kc_b = jax.random.split(jax.random.fold_in(key, 1000))
    w_cls = uniform(kc_w, (hidden_size, num_labels))   # (H, L)
    b_cls = uniform(kc_b, (1, num_labels))

    def fuse(p):
        wi = jnp.concatenate([p["wir"], p["wiz"], p["win"]], axis=1)        # (Din, 3H)
        wh = jnp.concatenate([p["whr"], p["whz"], p["whn"]], axis=1)        # (H, 3H)
        bi = jnp.concatenate([p["b_ir"] + p["b_hr"],
                              p["b_iz"] + p["b_hz"],
                              p["b_in"]], axis=1)                            # (1, 3H)
        return wi, wh, bi, p["b_hn"]

    wi1, wh1, bi1, bhn1 = fuse(raw_layers[0])
    wi2, wh2, bi2, bhn2 = fuse(raw_layers[1])

    # Pad classifier to a lane-dense 128-wide slab (sliced back in the wrapper).
    l_pad = max(128, ((num_labels + 127) // 128) * 128)
    wcls_pad = jnp.zeros((hidden_size, l_pad), jnp.float32).at[:, :num_labels].set(w_cls)
    bcls_pad = jnp.zeros((1, l_pad), jnp.float32).at[:, :num_labels].set(b_cls)

    kernel_params = dict(wi1=wi1, wh1=wh1, bi1=bi1, bhn1=bhn1,
                         wi2=wi2, wh2=wh2, bi2=bi2, bhn2=bhn2,
                         wcls=wcls_pad, bcls=bcls_pad)
    return raw_layers, kernel_params, w_cls, b_cls


# ---------------------------------------------------------------------------
# Pure-JAX reference (classic per-gate nn.GRU equations) for validation
# ---------------------------------------------------------------------------
def gru_net_ref(x_btd, raw_layers, w_cls, b_cls):
    h_seq = x_btd
    for p in raw_layers:
        B = h_seq.shape[0]
        H = p["whr"].shape[0]

        def step(h, x_t, p=p):
            r = jax.nn.sigmoid(x_t @ p["wir"] + p["b_ir"] + h @ p["whr"] + p["b_hr"])
            z = jax.nn.sigmoid(x_t @ p["wiz"] + p["b_iz"] + h @ p["whz"] + p["b_hz"])
            n = jnp.tanh(x_t @ p["win"] + p["b_in"] + r * (h @ p["whn"] + p["b_hn"]))
            h_new = (1.0 - z) * n + z * h
            return h_new, h_new

        h0 = jnp.zeros((B, H), jnp.float32)
        _, outs = jax.lax.scan(step, h0, jnp.transpose(h_seq, (1, 0, 2)))
        h_seq = jnp.transpose(outs, (1, 0, 2))
    last = h_seq[:, -1]
    return jnp.maximum(last @ w_cls + b_cls, 0.0)


# ---------------------------------------------------------------------------
if __name__ == "__main__":
    # Small, module-consistent shapes.
    B, T = 2, 8
    INPUT_SIZE, HIDDEN_SIZE, NUM_LABELS, NUM_LAYERS = 32, 32, 2, 2

    key = jax.random.PRNGKey(0)
    k_x, k_p = jax.random.split(key)
    x = jax.random.normal(k_x, (B, T, INPUT_SIZE), jnp.float32)

    raw_layers, kernel_params, w_cls, b_cls = init_params(
        k_p, INPUT_SIZE, HIDDEN_SIZE, NUM_LABELS, NUM_LAYERS)

    logits = gru_net_forward(x, kernel_params, num_labels=NUM_LABELS)
    logits = jax.block_until_ready(logits)

    ref = gru_net_ref(x, raw_layers, w_cls, b_cls)
    assert logits.shape == (B, NUM_LABELS)
    assert jnp.allclose(logits, ref, atol=1e-4, rtol=1e-4), (logits, ref)

    print("KERNEL_OK")
</pallas_src>

<mosaic_0001>
module attributes {stable_mosaic.version = 11 : i64} {
  func.func @gru_net_kernel(%arg0: memref<8x2x96xf32, #tpu.memory_space<vmem>>, %arg1: memref<32x96xf32, #tpu.memory_space<vmem>>, %arg2: memref<1x32xf32, #tpu.memory_space<vmem>>, %arg3: memref<32x96xf32, #tpu.memory_space<vmem>>, %arg4: memref<1x96xf32, #tpu.memory_space<vmem>>, %arg5: memref<32x96xf32, #tpu.memory_space<vmem>>, %arg6: memref<1x32xf32, #tpu.memory_space<vmem>>, %arg7: memref<32x128xf32, #tpu.memory_space<vmem>>, %arg8: memref<1x128xf32, #tpu.memory_space<vmem>>, %arg9: memref<2x128xf32, #tpu.memory_space<vmem>>) attributes {dimension_semantics = [], scalar_prefetch = 0 : i64, scratch_operands = 0 : i64, tpu.core_type = #tpu.core_type<tc>} {
    %c0 = arith.constant 0 : index
    %c0_0 = arith.constant 0 : index
    %0 = vector.load %arg1[%c0, %c0_0] : memref<32x96xf32, #tpu.memory_space<vmem>>, vector<32x96xf32>
    %c0_1 = arith.constant 0 : index
    %c0_2 = arith.constant 0 : index
    %1 = vector.load %arg3[%c0_1, %c0_2] : memref<32x96xf32, #tpu.memory_space<vmem>>, vector<32x96xf32>
    %c0_3 = arith.constant 0 : index
    %c0_4 = arith.constant 0 : index
    %2 = vector.load %arg5[%c0_3, %c0_4] : memref<32x96xf32, #tpu.memory_space<vmem>>, vector<32x96xf32>
    %c0_5 = arith.constant 0 : index
    %c0_6 = arith.constant 0 : index
    %3 = vector.load %arg2[%c0_5, %c0_6] : memref<1x32xf32, #tpu.memory_space<vmem>>, vector<1x32xf32>
    %c0_7 = arith.constant 0 : index
    %c0_8 = arith.constant 0 : index
    %4 = vector.load %arg4[%c0_7, %c0_8] : memref<1x96xf32, #tpu.memory_space<vmem>>, vector<1x96xf32>
    %c0_9 = arith.constant 0 : index
    %c0_10 = arith.constant 0 : index
    %5 = vector.load %arg6[%c0_9, %c0_10] : memref<1x32xf32, #tpu.memory_space<vmem>>, vector<1x32xf32>
    %cst = arith.constant 0.000000e+00 : f32
    %6 = vector.broadcast %cst : f32 to vector<2x32xf32>
    %c0_i32 = arith.constant 0 : i32
    %7 = arith.index_cast %c0_i32 : i32 to index
    %c0_11 = arith.constant 0 : index
    %c0_12 = arith.constant 0 : index
    %8 = vector.load %arg0[%7, %c0_11, %c0_12] : memref<8x2x96xf32, #tpu.memory_space<vmem>>, vector<1x2x96xf32>
    %9 = vector.shape_cast %8 : vector<1x2x96xf32> to vector<2x96xf32>
    %cst_13 = arith.constant dense<0.000000e+00> : vector<2x96xf32>
    %10 = tpu.matmul %6, %0, %cst_13 {dimension_numbers = #tpu.dot_dimension_numbers<[1], [0], [0], [1], [0, 0, 1, 1], [], []>} : vector<2x32xf32>, vector<32x96xf32>, vector<2x96xf32> -> vector<2x96xf32>
    %11 = vector.extract_strided_slice %9 {offsets = [0, 0], sizes = [2, 32], strides = [1, 1]} : vector<2x96xf32> to vector<2x32xf32>
    %12 = vector.extract_strided_slice %10 {offsets = [0, 0], sizes = [2, 32], strides = [1, 1]} : vector<2x96xf32> to vector<2x32xf32>
    %13 = arith.addf %11, %12 : vector<2x32xf32>
    %14 = arith.negf %13 : vector<2x32xf32>
    %15 = math.exp %14 : vector<2x32xf32>
    %cst_14 = arith.constant 1.000000e+00 : f32
    %16 = vector.broadcast %cst_14 : f32 to vector<2x32xf32>
    %17 = arith.addf %16, %15 : vector<2x32xf32>
    %18 = arith.divf %16, %17 : vector<2x32xf32>
    %19 = vector.extract_strided_slice %9 {offsets = [0, 32], sizes = [2, 32], strides = [1, 1]} : vector<2x96xf32> to vector<2x32xf32>
    %20 = vector.extract_strided_slice %10 {offsets = [0, 32], sizes = [2, 32], strides = [1, 1]} : vector<2x96xf32> to vector<2x32xf32>
    %21 = arith.addf %19, %20 : vector<2x32xf32>
    %22 = arith.negf %21 : vector<2x32xf32>
    %23 = math.exp %22 : vector<2x32xf32>
    %cst_15 = arith.constant 1.000000e+00 : f32
    %24 = vector.broadcast %cst_15 : f32 to vector<2x32xf32>
    %25 = arith.addf %24, %23 : vector<2x32xf32>
    %26 = arith.divf %24, %25 : vector<2x32xf32>
    %27 = vector.extract_strided_slice %9 {offsets = [0, 64], sizes = [2, 32], strides = [1, 1]} : vector<2x96xf32> to vector<2x32xf32>
    %28 = vector.extract_strided_slice %10 {offsets = [0, 64], sizes = [2, 32], strides = [1, 1]} : vector<2x96xf32> to vector<2x32xf32>
    %29 = vector.broadcast %3 : vector<1x32xf32> to vector<2x32xf32>
    %30 = arith.addf %28, %29 : vector<2x32xf32>
    %31 = arith.mulf %18, %30 : vector<2x32xf32>
    %32 = arith.addf %27, %31 : vector<2x32xf32>
    %33 = math.tanh %32 : vector<2x32xf32>
    %cst_16 = arith.constant 1.000000e+00 : f32
    %34 = vector.broadcast %cst_16 : f32 to vector<2x32xf32>
    %35 = arith.subf %34, %26 : vector<2x32xf32>
    %36 = arith.mulf %35, %33 : vector<2x32xf32>
    %37 = arith.mulf %26, %6 : vector<2x32xf32>
    %38 = arith.addf %36, %37 : vector<2x32xf32>
    %cst_17 = arith.constant dense<0.000000e+00> : vector<2x96xf32>
    %39 = tpu.matmul %38, %1, %cst_17 {dimension_numbers = #tpu.dot_dimension_numbers<[1], [0], [0], [1], [0, 0, 1, 1], [], []>} : vector<2x32xf32>, vector<32x96xf32>, vector<2x96xf32> -> vector<2x96xf32>
    %40 = vector.broadcast %4 : vector<1x96xf32> to vector<2x96xf32>
    %41 = arith.addf %39, %40 : vector<2x96xf32>
    %cst_18 = arith.constant dense<0.000000e+00> : vector<2x96xf32>
    %42 = tpu.matmul %6, %2, %cst_18 {dimension_numbers = #tpu.dot_dimension_numbers<[1], [0], [0], [1], [0, 0, 1, 1], [], []>} : vector<2x32xf32>, vector<32x96xf32>, vector<2x96xf32> -> vector<2x96xf32>
    %43 = vector.extract_strided_slice %41 {offsets = [0, 0], sizes = [2, 32], strides = [1, 1]} : vector<2x96xf32> to vector<2x32xf32>
    %44 = vector.extract_strided_slice %42 {offsets = [0, 0], sizes = [2, 32], strides = [1, 1]} : vector<2x96xf32> to vector<2x32xf32>
    %45 = arith.addf %43, %44 : vector<2x32xf32>
    %46 = arith.negf %45 : vector<2x32xf32>
    %47 = math.exp %46 : vector<2x32xf32>
    %cst_19 = arith.constant 1.000000e+00 : f32
    %48 = vector.broadcast %cst_19 : f32 to vector<2x32xf32>
    %49 = arith.addf %48, %47 : vector<2x32xf32>
    %50 = arith.divf %48, %49 : vector<2x32xf32>
    %51 = vector.extract_strided_slice %41 {offsets = [0, 32], sizes = [2, 32], strides = [1, 1]} : vector<2x96xf32> to vector<2x32xf32>
    %52 = vector.extract_strided_slice %42 {offsets = [0, 32], sizes = [2, 32], strides = [1, 1]} : vector<2x96xf32> to vector<2x32xf32>
    %53 = arith.addf %51, %52 : vector<2x32xf32>
    %54 = arith.negf %53 : vector<2x32xf32>
    %55 = math.exp %54 : vector<2x32xf32>
    %cst_20 = arith.constant 1.000000e+00 : f32
    %56 = vector.broadcast %cst_20 : f32 to vector<2x32xf32>
    %57 = arith.addf %56, %55 : vector<2x32xf32>
    %58 = arith.divf %56, %57 : vector<2x32xf32>
    %59 = vector.extract_strided_slice %41 {offsets = [0, 64], sizes = [2, 32], strides = [1, 1]} : vector<2x96xf32> to vector<2x32xf32>
    %60 = vector.extract_strided_slice %42 {offsets = [0, 64], sizes = [2, 32], strides = [1, 1]} : vector<2x96xf32> to vector<2x32xf32>
    %61 = vector.broadcast %5 : vector<1x32xf32> to vector<2x32xf32>
    %62 = arith.addf %60, %61 : vector<2x32xf32>
    %63 = arith.mulf %50, %62 : vector<2x32xf32>
    %64 = arith.addf %59, %63 : vector<2x32xf32>
    %65 = math.tanh %64 : vector<2x32xf32>
    %cst_21 = arith.constant 1.000000e+00 : f32
    %66 = vector.broadcast %cst_21 : f32 to vector<2x32xf32>
    %67 = arith.subf %66, %58 : vector<2x32xf32>
    %68 = arith.mulf %67, %65 : vector<2x32xf32>
    %69 = arith.mulf %58, %6 : vector<2x32xf32>
    %70 = arith.addf %68, %69 : vector<2x32xf32>
    %c1_i32 = arith.constant 1 : i32
    %71 = arith.index_cast %c1_i32 : i32 to index
    %c0_22 = arith.constant 0 : index
    %c0_23 = arith.constant 0 : index
    %72 = vector.load %arg0[%71, %c0_22, %c0_23] : memref<8x2x96xf32, #tpu.memory_space<vmem>>, vector<1x2x96xf32>
    %73 = vector.shape_cast %72 : vector<1x2x96xf32> to vector<2x96xf32>
    %cst_24 = arith.constant dense<0.000000e+00> : vector<2x96xf32>
    %74 = tpu.matmul %38, %0, %cst_24 {dimension_numbers = #tpu.dot_dimension_numbers<[1], [0], [0], [1], [0, 0, 1, 1], [], []>} : vector<2x32xf32>, vector<32x96xf32>, vector<2x96xf32> -> vector<2x96xf32>
    %75 = vector.extract_strided_slice %73 {offsets = [0, 0], sizes = [2, 32], strides = [1, 1]} : vector<2x96xf32> to vector<2x32xf32>
    %76 = vector.extract_strided_slice %74 {offsets = [0, 0], sizes = [2, 32], strides = [1, 1]} : vector<2x96xf32> to vector<2x32xf32>
    %77 = arith.addf %75, %76 : vector<2x32xf32>
    %78 = arith.negf %77 : vector<2x32xf32>
    %79 = math.exp %78 : vector<2x32xf32>
    %cst_25 = arith.constant 1.000000e+00 : f32
    %80 = vector.broadcast %cst_25 : f32 to vector<2x32xf32>
    %81 = arith.addf %80, %79 : vector<2x32xf32>
    %82 = arith.divf %80, %81 : vector<2x32xf32>
    %83 = vector.extract_strided_slice %73 {offsets = [0, 32], sizes = [2, 32], strides = [1, 1]} : vector<2x96xf32> to vector<2x32xf32>
    %84 = vector.extract_strided_slice %74 {offsets = [0, 32], sizes = [2, 32], strides = [1, 1]} : vector<2x96xf32> to vector<2x32xf32>
    %85 = arith.addf %83, %84 : vector<2x32xf32>
    %86 = arith.negf %85 : vector<2x32xf32>
    %87 = math.exp %86 : vector<2x32xf32>
    %cst_26 = arith.constant 1.000000e+00 : f32
    %88 = vector.broadcast %cst_26 : f32 to vector<2x32xf32>
    %89 = arith.addf %88, %87 : vector<2x32xf32>
    %90 = arith.divf %88, %89 : vector<2x32xf32>
    %91 = vector.extract_strided_slice %73 {offsets = [0, 64], sizes = [2, 32], strides = [1, 1]} : vector<2x96xf32> to vector<2x32xf32>
    %92 = vector.extract_strided_slice %74 {offsets = [0, 64], sizes = [2, 32], strides = [1, 1]} : vector<2x96xf32> to vector<2x32xf32>
    %93 = vector.broadcast %3 : vector<1x32xf32> to vector<2x32xf32>
    %94 = arith.addf %92, %93 : vector<2x32xf32>
    %95 = arith.mulf %82, %94 : vector<2x32xf32>
    %96 = arith.addf %91, %95 : vector<2x32xf32>
    %97 = math.tanh %96 : vector<2x32xf32>
    %cst_27 = arith.constant 1.000000e+00 : f32
    %98 = vector.broadcast %cst_27 : f32 to vector<2x32xf32>
    %99 = arith.subf %98, %90 : vector<2x32xf32>
    %100 = arith.mulf %99, %97 : vector<2x32xf32>
    %101 = arith.mulf %90, %38 : vector<2x32xf32>
    %102 = arith.addf %100, %101 : vector<2x32xf32>
    %cst_28 = arith.constant dense<0.000000e+00> : vector<2x96xf32>
    %103 = tpu.matmul %102, %1, %cst_28 {dimension_numbers = #tpu.dot_dimension_numbers<[1], [0], [0], [1], [0, 0, 1, 1], [], []>} : vector<2x32xf32>, vector<32x96xf32>, vector<2x96xf32> -> vector<2x96xf32>
    %104 = vector.broadcast %4 : vector<1x96xf32> to vector<2x96xf32>
    %105 = arith.addf %103, %104 : vector<2x96xf32>
    %cst_29 = arith.constant dense<0.000000e+00> : vector<2x96xf32>
    %106 = tpu.matmul %70, %2, %cst_29 {dimension_numbers = #tpu.dot_dimension_numbers<[1], [0], [0], [1], [0, 0, 1, 1], [], []>} : vector<2x32xf32>, vector<32x96xf32>, vector<2x96xf32> -> vector<2x96xf32>
    %107 = vector.extract_strided_slice %105 {offsets = [0, 0], sizes = [2, 32], strides = [1, 1]} : vector<2x96xf32> to vector<2x32xf32>
    %108 = vector.extract_strided_slice %106 {offsets = [0, 0], sizes = [2, 32], strides = [1, 1]} : vector<2x96xf32> to vector<2x32xf32>
    %109 = arith.addf %107, %108 : vector<2x32xf32>
    %110 = arith.negf %109 : vector<2x32xf32>
    %111 = math.exp %110 : vector<2x32xf32>
    %cst_30 = arith.constant 1.000000e+00 : f32
    %112 = vector.broadcast %cst_30 : f32 to vector<2x32xf32>
    %113 = arith.addf %112, %111 : vector<2x32xf32>
    %114 = arith.divf %112, %113 : vector<2x32xf32>
    %115 = vector.extract_strided_slice %105 {offsets = [0, 32], sizes = [2, 32], strides = [1, 1]} : vector<2x96xf32> to vector<2x32xf32>
    %116 = vector.extract_strided_slice %106 {offsets = [0, 32], sizes = [2, 32], strides = [1, 1]} : vector<2x96xf32> to vector<2x32xf32>
    %117 = arith.addf %115, %116 : vector<2x32xf32>
    %118 = arith.negf %117 : vector<2x32xf32>
    %119 = math.exp %118 : vector<2x32xf32>
    %cst_31 = arith.constant 1.000000e+00 : f32
    %120 = vector.broadcast %cst_31 : f32 to vector<2x32xf32>
    %121 = arith.addf %120, %119 : vector<2x32xf32>
    %122 = arith.divf %120, %121 : vector<2x32xf32>
    %123 = vector.extract_strided_slice %105 {offsets = [0, 64], sizes = [2, 32], strides = [1, 1]} : vector<2x96xf32> to vector<2x32xf32>
    %124 = vector.extract_strided_slice %106 {offsets = [0, 64], sizes = [2, 32], strides = [1, 1]} : vector<2x96xf32> to vector<2x32xf32>
    %125 = vector.broadcast %5 : vector<1x32xf32> to vector<2x32xf32>
    %126 = arith.addf %124, %125 : vector<2x32xf32>
    %127 = arith.mulf %114, %126 : vector<2x32xf32>
    %128 = arith.addf %123, %127 : vector<2x32xf32>
    %129 = math.tanh %128 : vector<2x32xf32>
    %cst_32 = arith.constant 1.000000e+00 : f32
    %130 = vector.broadcast %cst_32 : f32 to vector<2x32xf32>
    %131 = arith.subf %130, %122 : vector<2x32xf32>
    %132 = arith.mulf %131, %129 : vector<2x32xf32>
    %133 = arith.mulf %122, %70 : vector<2x32xf32>
    %134 = arith.addf %132, %133 : vector<2x32xf32>
    %c2_i32 = arith.constant 2 : i32
    %135 = arith.index_cast %c2_i32 : i32 to index
    %c0_33 = arith.constant 0 : index
    %c0_34 = arith.constant 0 : index
    %136 = vector.load %arg0[%135, %c0_33, %c0_34] : memref<8x2x96xf32, #tpu.memory_space<vmem>>, vector<1x2x96xf32>
    %137 = vector.shape_cast %136 : vector<1x2x96xf32> to vector<2x96xf32>
    %cst_35 = arith.constant dense<0.000000e+00> : vector<2x96xf32>
    %138 = tpu.matmul %102, %0, %cst_35 {dimension_numbers = #tpu.dot_dimension_numbers<[1], [0], [0], [1], [0, 0, 1, 1], [], []>} : vector<2x32xf32>, vector<32x96xf32>, vector<2x96xf32> -> vector<2x96xf32>
    %139 = vector.extract_strided_slice %137 {offsets = [0, 0], sizes = [2, 32], strides = [1, 1]} : vector<2x96xf32> to vector<2x32xf32>
    %140 = vector.extract_strided_slice %138 {offsets = [0, 0], sizes = [2, 32], strides = [1, 1]} : vector<2x96xf32> to vector<2x32xf32>
    %141 = arith.addf %139, %140 : vector<2x32xf32>
    %142 = arith.negf %141 : vector<2x32xf32>
    %143 = math.exp %142 : vector<2x32xf32>
    %cst_36 = arith.constant 1.000000e+00 : f32
    %144 = vector.broadcast %cst_36 : f32 to vector<2x32xf32>
    %145 = arith.addf %144, %143 : vector<2x32xf32>
    %146 = arith.divf %144, %145 : vector<2x32xf32>
    %147 = vector.extract_strided_slice %137 {offsets = [0, 32], sizes = [2, 32], strides = [1, 1]} : vector<2x96xf32> to vector<2x32xf32>
    %148 = vector.extract_strided_slice %138 {offsets = [0, 32], sizes = [2, 32], strides = [1, 1]} : vector<2x96xf32> to vector<2x32xf32>
    %149 = arith.addf %147, %148 : vector<2x32xf32>
    %150 = arith.negf %149 : vector<2x32xf32>
    %151 = math.exp %150 : vector<2x32xf32>
    %cst_37 = arith.constant 1.000000e+00 : f32
    %152 = vector.broadcast %cst_37 : f32 to vector<2x32xf32>
    %153 = arith.addf %152, %151 : vector<2x32xf32>
    %154 = arith.divf %152, %153 : vector<2x32xf32>
    %155 = vector.extract_strided_slice %137 {offsets = [0, 64], sizes = [2, 32], strides = [1, 1]} : vector<2x96xf32> to vector<2x32xf32>
    %156 = vector.extract_strided_slice %138 {offsets = [0, 64], sizes = [2, 32], strides = [1, 1]} : vector<2x96xf32> to vector<2x32xf32>
    %157 = vector.broadcast %3 : vector<1x32xf32> to vector<2x32xf32>
    %158 = arith.addf %156, %157 : vector<2x32xf32>
    %159 = arith.mulf %146, %158 : vector<2x32xf32>
    %160 = arith.addf %155, %159 : vector<2x32xf32>
    %161 = math.tanh %160 : vector<2x32xf32>
    %cst_38 = arith.constant 1.000000e+00 : f32
    %162 = vector.broadcast %cst_38 : f32 to vector<2x32xf32>
    %163 = arith.subf %162, %154 : vector<2x32xf32>
    %164 = arith.mulf %163, %161 : vector<2x32xf32>
    %165 = arith.mulf %154, %102 : vector<2x32xf32>
    %166 = arith.addf %164, %165 : vector<2x32xf32>
    %cst_39 = arith.constant dense<0.000000e+00> : vector<2x96xf32>
    %167 = tpu.matmul %166, %1, %cst_39 {dimension_numbers = #tpu.dot_dimension_numbers<[1], [0], [0], [1], [0, 0, 1, 1], [], []>} : vector<2x32xf32>, vector<32x96xf32>, vector<2x96xf32> -> vector<2x96xf32>
    %168 = vector.broadcast %4 : vector<1x96xf32> to vector<2x96xf32>
    %169 = arith.addf %167, %168 : vector<2x96xf32>
    %cst_40 = arith.constant dense<0.000000e+00> : vector<2x96xf32>
    %170 = tpu.matmul %134, %2, %cst_40 {dimension_numbers = #tpu.dot_dimension_numbers<[1], [0], [0], [1], [0, 0, 1, 1], [], []>} : vector<2x32xf32>, vector<32x96xf32>, vector<2x96xf32> -> vector<2x96xf32>
    %171 = vector.extract_strided_slice %169 {offsets = [0, 0], sizes = [2, 32], strides = [1, 1]} : vector<2x96xf32> to vector<2x32xf32>
    %172 = vector.extract_strided_slice %170 {offsets = [0, 0], sizes = [2, 32], strides = [1, 1]} : vector<2x96xf32> to vector<2x32xf32>
    %173 = arith.addf %171, %172 : vector<2x32xf32>
    %174 = arith.negf %173 : vector<2x32xf32>
    %175 = math.exp %174 : vector<2x32xf32>
    %cst_41 = arith.constant 1.000000e+00 : f32
    %176 = vector.broadcast %cst_41 : f32 to vector<2x32xf32>
    %177 = arith.addf %176, %175 : vector<2x32xf32>
    %178 = arith.divf %176, %177 : vector<2x32xf32>
    %179 = vector.extract_strided_slice %169 {offsets = [0, 32], sizes = [2, 32], strides = [1, 1]} : vector<2x96xf32> to vector<2x32xf32>
    %180 = vector.extract_strided_slice %170 {offsets = [0, 32], sizes = [2, 32], strides = [1, 1]} : vector<2x96xf32> to vector<2x32xf32>
    %181 = arith.addf %179, %180 : vector<2x32xf32>
    %182 = arith.negf %181 : vector<2x32xf32>
    %183 = math.exp %182 : vector<2x32xf32>
    %cst_42 = arith.constant 1.000000e+00 : f32
    %184 = vector.broadcast %cst_42 : f32 to vector<2x32xf32>
    %185 = arith.addf %184, %183 : vector<2x32xf32>
    %186 = arith.divf %184, %185 : vector<2x32xf32>
    %187 = vector.extract_strided_slice %169 {offsets = [0, 64], sizes = [2, 32], strides = [1, 1]} : vector<2x96xf32> to vector<2x32xf32>
    %188 = vector.extract_strided_slice %170 {offsets = [0, 64], sizes = [2, 32], strides = [1, 1]} : vector<2x96xf32> to vector<2x32xf32>
    %189 = vector.broadcast %5 : vector<1x32xf32> to vector<2x32xf32>
    %190 = arith.addf %188, %189 : vector<2x32xf32>
    %191 = arith.mulf %178, %190 : vector<2x32xf32>
    %192 = arith.addf %187, %191 : vector<2x32xf32>
    %193 = math.tanh %192 : vector<2x32xf32>
    %cst_43 = arith.constant 1.000000e+00 : f32
    %194 = vector.broadcast %cst_43 : f32 to vector<2x32xf32>
    %195 = arith.subf %194, %186 : vector<2x32xf32>
    %196 = arith.mulf %195, %193 : vector<2x32xf32>
    %197 = arith.mulf %186, %134 : vector<2x32xf32>
    %198 = arith.addf %196, %197 : vector<2x32xf32>
    %c3_i32 = arith.constant 3 : i32
    %199 = arith.index_cast %c3_i32 : i32 to index
    %c0_44 = arith.constant 0 : index
    %c0_45 = arith.constant 0 : index
    %200 = vector.load %arg0[%199, %c0_44, %c0_45] : memref<8x2x96xf32, #tpu.memory_space<vmem>>, vector<1x2x96xf32>
    %201 = vector.shape_cast %200 : vector<1x2x96xf32> to vector<2x96xf32>
    %cst_46 = arith.constant dense<0.000000e+00> : vector<2x96xf32>
    %202 = tpu.matmul %166, %0, %cst_46 {dimension_numbers = #tpu.dot_dimension_numbers<[1], [0], [0], [1], [0, 0, 1, 1], [], []>} : vector<2x32xf32>, vector<32x96xf32>, vector<2x96xf32> -> vector<2x96xf32>
    %203 = vector.extract_strided_slice %201 {offsets = [0, 0], sizes = [2, 32], strides = [1, 1]} : vector<2x96xf32> to vector<2x32xf32>
    %204 = vector.extract_strided_slice %202 {offsets = [0, 0], sizes = [2, 32], strides = [1, 1]} : vector<2x96xf32> to vector<2x32xf32>
    %205 = arith.addf %203, %204 : vector<2x32xf32>
    %206 = arith.negf %205 : vector<2x32xf32>
    %207 = math.exp %206 : vector<2x32xf32>
    %cst_47 = arith.constant 1.000000e+00 : f32
    %208 = vector.broadcast %cst_47 : f32 to vector<2x32xf32>
    %209 = arith.addf %208, %207 : vector<2x32xf32>
    %210 = arith.divf %208, %209 : vector<2x32xf32>
    %211 = vector.extract_strided_slice %201 {offsets = [0, 32], sizes = [2, 32], strides = [1, 1]} : vector<2x96xf32> to vector<2x32xf32>
    %212 = vector.extract_strided_slice %202 {offsets = [0, 32], sizes = [2, 32], strides = [1, 1]} : vector<2x96xf32> to vector<2x32xf32>
    %213 = arith.addf %211, %212 : vector<2x32xf32>
    %214 = arith.negf %213 : vector<2x32xf32>
    %215 = math.exp %214 : vector<2x32xf32>
    %cst_48 = arith.constant 1.000000e+00 : f32
    %216 = vector.broadcast %cst_48 : f32 to vector<2x32xf32>
    %217 = arith.addf %216, %215 : vector<2x32xf32>
    %218 = arith.divf %216, %217 : vector<2x32xf32>
    %219 = vector.extract_strided_slice %201 {offsets = [0, 64], sizes = [2, 32], strides = [1, 1]} : vector<2x96xf32> to vector<2x32xf32>
    %220 = vector.extract_strided_slice %202 {offsets = [0, 64], sizes = [2, 32], strides = [1, 1]} : vector<2x96xf32> to vector<2x32xf32>
    %221 = vector.broadcast %3 : vector<1x32xf32> to vector<2x32xf32>
    %222 = arith.addf %220, %221 : vector<2x32xf32>
    %223 = arith.mulf %210, %222 : vector<2x32xf32>
    %224 = arith.addf %219, %223 : vector<2x32xf32>
    %225 = math.tanh %224 : vector<2x32xf32>
    %cst_49 = arith.constant 1.000000e+00 : f32
    %226 = vector.broadcast %cst_49 : f32 to vector<2x32xf32>
    %227 = arith.subf %226, %218 : vector<2x32xf32>
    %228 = arith.mulf %227, %225 : vector<2x32xf32>
    %229 = arith.mulf %218, %166 : vector<2x32xf32>
    %230 = arith.addf %228, %229 : vector<2x32xf32>
    %cst_50 = arith.constant dense<0.000000e+00> : vector<2x96xf32>
    %231 = tpu.matmul %230, %1, %cst_50 {dimension_numbers = #tpu.dot_dimension_numbers<[1], [0], [0], [1], [0, 0, 1, 1], [], []>} : vector<2x32xf32>, vector<32x96xf32>, vector<2x96xf32> -> vector<2x96xf32>
    %232 = vector.broadcast %4 : vector<1x96xf32> to vector<2x96xf32>
    %233 = arith.addf %231, %232 : vector<2x96xf32>
    %cst_51 = arith.constant dense<0.000000e+00> : vector<2x96xf32>
    %234 = tpu.matmul %198, %2, %cst_51 {dimension_numbers = #tpu.dot_dimension_numbers<[1], [0], [0], [1], [0, 0, 1, 1], [], []>} : vector<2x32xf32>, vector<32x96xf32>, vector<2x96xf32> -> vector<2x96xf32>
    %235 = vector.extract_strided_slice %233 {offsets = [0, 0], sizes = [2, 32], strides = [1, 1]} : vector<2x96xf32> to vector<2x32xf32>
    %236 = vector.extract_strided_slice %234 {offsets = [0, 0], sizes = [2, 32], strides = [1, 1]} : vector<2x96xf32> to vector<2x32xf32>
    %237 = arith.addf %235, %236 : vector<2x32xf32>
    %238 = arith.negf %237 : vector<2x32xf32>
    %239 = math.exp %238 : vector<2x32xf32>
    %cst_52 = arith.constant 1.000000e+00 : f32
    %240 = vector.broadcast %cst_52 : f32 to vector<2x32xf32>
    %241 = arith.addf %240, %239 : vector<2x32xf32>
    %242 = arith.divf %240, %241 : vector<2x32xf32>
    %243 = vector.extract_strided_slice %233 {offsets = [0, 32], sizes = [2, 32], strides = [1, 1]} : vector<2x96xf32> to vector<2x32xf32>
    %244 = vector.extract_strided_slice %234 {offsets = [0, 32], sizes = [2, 32], strides = [1, 1]} : vector<2x96xf32> to vector<2x32xf32>
    %245 = arith.addf %243, %244 : vector<2x32xf32>
    %246 = arith.negf %245 : vector<2x32xf32>
    %247 = math.exp %246 : vector<2x32xf32>
    %cst_53 = arith.constant 1.000000e+00 : f32
    %248 = vector.broadcast %cst_53 : f32 to vector<2x32xf32>
    %249 = arith.addf %248, %247 : vector<2x32xf32>
    %250 = arith.divf %248, %249 : vector<2x32xf32>
    %251 = vector.extract_strided_slice %233 {offsets = [0, 64], sizes = [2, 32], strides = [1, 1]} : vector<2x96xf32> to vector<2x32xf32>
    %252 = vector.extract_strided_slice %234 {offsets = [0, 64], sizes = [2, 32], strides = [1, 1]} : vector<2x96xf32> to vector<2x32xf32>
    %253 = vector.broadcast %5 : vector<1x32xf32> to vector<2x32xf32>
    %254 = arith.addf %252, %253 : vector<2x32xf32>
    %255 = arith.mulf %242, %254 : vector<2x32xf32>
    %256 = arith.addf %251, %255 : vector<2x32xf32>
    %257 = math.tanh %256 : vector<2x32xf32>
    %cst_54 = arith.constant 1.000000e+00 : f32
    %258 = vector.broadcast %cst_54 : f32 to vector<2x32xf32>
    %259 = arith.subf %258, %250 : vector<2x32xf32>
    %260 = arith.mulf %259, %257 : vector<2x32xf32>
    %261 = arith.mulf %250, %198 : vector<2x32xf32>
    %262 = arith.addf %260, %261 : vector<2x32xf32>
    %c4_i32 = arith.constant 4 : i32
    %263 = arith.index_cast %c4_i32 : i32 to index
    %c0_55 = arith.constant 0 : index
    %c0_56 = arith.constant 0 : index
    %264 = vector.load %arg0[%263, %c0_55, %c0_56] : memref<8x2x96xf32, #tpu.memory_space<vmem>>, vector<1x2x96xf32>
    %265 = vector.shape_cast %264 : vector<1x2x96xf32> to vector<2x96xf32>
    %cst_57 = arith.constant dense<0.000000e+00> : vector<2x96xf32>
    %266 = tpu.matmul %230, %0, %cst_57 {dimension_numbers = #tpu.dot_dimension_numbers<[1], [0], [0], [1], [0, 0, 1, 1], [], []>} : vector<2x32xf32>, vector<32x96xf32>, vector<2x96xf32> -> vector<2x96xf32>
    %267 = vector.extract_strided_slice %265 {offsets = [0, 0], sizes = [2, 32], strides = [1, 1]} : vector<2x96xf32> to vector<2x32xf32>
    %268 = vector.extract_strided_slice %266 {offsets = [0, 0], sizes = [2, 32], strides = [1, 1]} : vector<2x96xf32> to vector<2x32xf32>
    %269 = arith.addf %267, %268 : vector<2x32xf32>
    %270 = arith.negf %269 : vector<2x32xf32>
    %271 = math.exp %270 : vector<2x32xf32>
    %cst_58 = arith.constant 1.000000e+00 : f32
    %272 = vector.broadcast %cst_58 : f32 to vector<2x32xf32>
    %273 = arith.addf %272, %271 : vector<2x32xf32>
    %274 = arith.divf %272, %273 : vector<2x32xf32>
    %275 = vector.extract_strided_slice %265 {offsets = [0, 32], sizes = [2, 32], strides = [1, 1]} : vector<2x96xf32> to vector<2x32xf32>
    %276 = vector.extract_strided_slice %266 {offsets = [0, 32], sizes = [2, 32], strides = [1, 1]} : vector<2x96xf32> to vector<2x32xf32>
    %277 = arith.addf %275, %276 : vector<2x32xf32>
    %278 = arith.negf %277 : vector<2x32xf32>
    %279 = math.exp %278 : vector<2x32xf32>
    %cst_59 = arith.constant 1.000000e+00 : f32
    %280 = vector.broadcast %cst_59 : f32 to vector<2x32xf32>
    %281 = arith.addf %280, %279 : vector<2x32xf32>
    %282 = arith.divf %280, %281 : vector<2x32xf32>
    %283 = vector.extract_strided_slice %265 {offsets = [0, 64], sizes = [2, 32], strides = [1, 1]} : vector<2x96xf32> to vector<2x32xf32>
    %284 = vector.extract_strided_slice %266 {offsets = [0, 64], sizes = [2, 32], strides = [1, 1]} : vector<2x96xf32> to vector<2x32xf32>
    %285 = vector.broadcast %3 : vector<1x32xf32> to vector<2x32xf32>
    %286 = arith.addf %284, %285 : vector<2x32xf32>
    %287 = arith.mulf %274, %286 : vector<2x32xf32>
    %288 = arith.addf %283, %287 : vector<2x32xf32>
    %289 = math.tanh %288 : vector<2x32xf32>
    %cst_60 = arith.constant 1.000000e+00 : f32
    %290 = vector.broadcast %cst_60 : f32 to vector<2x32xf32>
    %291 = arith.subf %290, %282 : vector<2x32xf32>
    %292 = arith.mulf %291, %289 : vector<2x32xf32>
    %293 = arith.mulf %282, %230 : vector<2x32xf32>
    %294 = arith.addf %292, %293 : vector<2x32xf32>
    %cst_61 = arith.constant dense<0.000000e+00> : vector<2x96xf32>
    %295 = tpu.matmul %294, %1, %cst_61 {dimension_numbers = #tpu.dot_dimension_numbers<[1], [0], [0], [1], [0, 0, 1, 1], [], []>} : vector<2x32xf32>, vector<32x96xf32>, vector<2x96xf32> -> vector<2x96xf32>
    %296 = vector.broadcast %4 : vector<1x96xf32> to vector<2x96xf32>
    %297 = arith.addf %295, %296 : vector<2x96xf32>
    %cst_62 = arith.constant dense<0.000000e+00> : vector<2x96xf32>
    %298 = tpu.matmul %262, %2, %cst_62 {dimension_numbers = #tpu.dot_dimension_numbers<[1], [0], [0], [1], [0, 0, 1, 1], [], []>} : vector<2x32xf32>, vector<32x96xf32>, vector<2x96xf32> -> vector<2x96xf32>
    %299 = vector.extract_strided_slice %297 {offsets = [0, 0], sizes = [2, 32], strides = [1, 1]} : vector<2x96xf32> to vector<2x32xf32>
    %300 = vector.extract_strided_slice %298 {offsets = [0, 0], sizes = [2, 32], strides = [1, 1]} : vector<2x96xf32> to vector<2x32xf32>
    %301 = arith.addf %299, %300 : vector<2x32xf32>
    %302 = arith.negf %301 : vector<2x32xf32>
    %303 = math.exp %302 : vector<2x32xf32>
    %cst_63 = arith.constant 1.000000e+00 : f32
    %304 = vector.broadcast %cst_63 : f32 to vector<2x32xf32>
    %305 = arith.addf %304, %303 : vector<2x32xf32>
    %306 = arith.divf %304, %305 : vector<2x32xf32>
    %307 = vector.extract_strided_slice %297 {offsets = [0, 32], sizes = [2, 32], strides = [1, 1]} : vector<2x96xf32> to vector<2x32xf32>
    %308 = vector.extract_strided_slice %298 {offsets = [0, 32], sizes = [2, 32], strides = [1, 1]} : vector<2x96xf32> to vector<2x32xf32>
    %309 = arith.addf %307, %308 : vector<2x32xf32>
    %310 = arith.negf %309 : vector<2x32xf32>
    %311 = math.exp %310 : vector<2x32xf32>
    %cst_64 = arith.constant 1.000000e+00 : f32
    %312 = vector.broadcast %cst_64 : f32 to vector<2x32xf32>
    %313 = arith.addf %312, %311 : vector<2x32xf32>
    %314 = arith.divf %312, %313 : vector<2x32xf32>
    %315 = vector.extract_strided_slice %297 {offsets = [0, 64], sizes = [2, 32], strides = [1, 1]} : vector<2x96xf32> to vector<2x32xf32>
    %316 = vector.extract_strided_slice %298 {offsets = [0, 64], sizes = [2, 32], strides = [1, 1]} : vector<2x96xf32> to vector<2x32xf32>
    %317 = vector.broadcast %5 : vector<1x32xf32> to vector<2x32xf32>
    %318 = arith.addf %316, %317 : vector<2x32xf32>
    %319 = arith.mulf %306, %318 : vector<2x32xf32>
    %320 = arith.addf %315, %319 : vector<2x32xf32>
    %321 = math.tanh %320 : vector<2x32xf32>
    %cst_65 = arith.constant 1.000000e+00 : f32
    %322 = vector.broadcast %cst_65 : f32 to vector<2x32xf32>
    %323 = arith.subf %322, %314 : vector<2x32xf32>
    %324 = arith.mulf %323, %321 : vector<2x32xf32>
    %325 = arith.mulf %314, %262 : vector<2x32xf32>
    %326 = arith.addf %324, %325 : vector<2x32xf32>
    %c5_i32 = arith.constant 5 : i32
    %327 = arith.index_cast %c5_i32 : i32 to index
    %c0_66 = arith.constant 0 : index
    %c0_67 = arith.constant 0 : index
    %328 = vector.load %arg0[%327, %c0_66, %c0_67] : memref<8x2x96xf32, #tpu.memory_space<vmem>>, vector<1x2x96xf32>
    %329 = vector.shape_cast %328 : vector<1x2x96xf32> to vector<2x96xf32>
    %cst_68 = arith.constant dense<0.000000e+00> : vector<2x96xf32>
    %330 = tpu.matmul %294, %0, %cst_68 {dimension_numbers = #tpu.dot_dimension_numbers<[1], [0], [0], [1], [0, 0, 1, 1], [], []>} : vector<2x32xf32>, vector<32x96xf32>, vector<2x96xf32> -> vector<2x96xf32>
    %331 = vector.extract_strided_slice %329 {offsets = [0, 0], sizes = [2, 32], strides = [1, 1]} : vector<2x96xf32> to vector<2x32xf32>
    %332 = vector.extract_strided_slice %330 {offsets = [0, 0], sizes = [2, 32], strides = [1, 1]} : vector<2x96xf32> to vector<2x32xf32>
    %333 = arith.addf %331, %332 : vector<2x32xf32>
    %334 = arith.negf %333 : vector<2x32xf32>
    %335 = math.exp %334 : vector<2x32xf32>
    %cst_69 = arith.constant 1.000000e+00 : f32
    %336 = vector.broadcast %cst_69 : f32 to vector<2x32xf32>
    %337 = arith.addf %336, %335 : vector<2x32xf32>
    %338 = arith.divf %336, %337 : vector<2x32xf32>
    %339 = vector.extract_strided_slice %329 {offsets = [0, 32], sizes = [2, 32], strides = [1, 1]} : vector<2x96xf32> to vector<2x32xf32>
    %340 = vector.extract_strided_slice %330 {offsets = [0, 32], sizes = [2, 32], strides = [1, 1]} : vector<2x96xf32> to vector<2x32xf32>
    %341 = arith.addf %339, %340 : vector<2x32xf32>
    %342 = arith.negf %341 : vector<2x32xf32>
    %343 = math.exp %342 : vector<2x32xf32>
    %cst_70 = arith.constant 1.000000e+00 : f32
    %344 = vector.broadcast %cst_70 : f32 to vector<2x32xf32>
    %345 = arith.addf %344, %343 : vector<2x32xf32>
    %346 = arith.divf %344, %345 : vector<2x32xf32>
    %347 = vector.extract_strided_slice %329 {offsets = [0, 64], sizes = [2, 32], strides = [1, 1]} : vector<2x96xf32> to vector<2x32xf32>
    %348 = vector.extract_strided_slice %330 {offsets = [0, 64], sizes = [2, 32], strides = [1, 1]} : vector<2x96xf32> to vector<2x32xf32>
    %349 = vector.broadcast %3 : vector<1x32xf32> to vector<2x32xf32>
    %350 = arith.addf %348, %349 : vector<2x32xf32>
    %351 = arith.mulf %338, %350 : vector<2x32xf32>
    %352 = arith.addf %347, %351 : vector<2x32xf32>
    %353 = math.tanh %352 : vector<2x32xf32>
    %cst_71 = arith.constant 1.000000e+00 : f32
    %354 = vector.broadcast %cst_71 : f32 to vector<2x32xf32>
    %355 = arith.subf %354, %346 : vector<2x32xf32>
    %356 = arith.mulf %355, %353 : vector<2x32xf32>
    %357 = arith.mulf %346, %294 : vector<2x32xf32>
    %358 = arith.addf %356, %357 : vector<2x32xf32>
    %cst_72 = arith.constant dense<0.000000e+00> : vector<2x96xf32>
    %359 = tpu.matmul %358, %1, %cst_72 {dimension_numbers = #tpu.dot_dimension_numbers<[1], [0], [0], [1], [0, 0, 1, 1], [], []>} : vector<2x32xf32>, vector<32x96xf32>, vector<2x96xf32> -> vector<2x96xf32>
    %360 = vector.broadcast %4 : vector<1x96xf32> to vector<2x96xf32>
    %361 = arith.addf %359, %360 : vector<2x96xf32>
    %cst_73 = arith.constant dense<0.000000e+00> : vector<2x96xf32>
    %362 = tpu.matmul %326, %2, %cst_73 {dimension_numbers = #tpu.dot_dimension_numbers<[1], [0], [0], [1], [0, 0, 1, 1], [], []>} : vector<2x32xf32>, vector<32x96xf32>, vector<2x96xf32> -> vector<2x96xf32>
    %363 = vector.extract_strided_slice %361 {offsets = [0, 0], sizes = [2, 32], strides = [1, 1]} : vector<2x96xf32> to vector<2x32xf32>
    %364 = vector.extract_strided_slice %362 {offsets = [0, 0], sizes = [2, 32], strides = [1, 1]} : vector<2x96xf32> to vector<2x32xf32>
    %365 = arith.addf %363, %364 : vector<2x32xf32>
    %366 = arith.negf %365 : vector<2x32xf32>
    %367 = math.exp %366 : vector<2x32xf32>
    %cst_74 = arith.constant 1.000000e+00 : f32
    %368 = vector.broadcast %cst_74 : f32 to vector<2x32xf32>
    %369 = arith.addf %368, %367 : vector<2x32xf32>
    %370 = arith.divf %368, %369 : vector<2x32xf32>
    %371 = vector.extract_strided_slice %361 {offsets = [0, 32], sizes = [2, 32], strides = [1, 1]} : vector<2x96xf32> to vector<2x32xf32>
    %372 = vector.extract_strided_slice %362 {offsets = [0, 32], sizes = [2, 32], strides = [1, 1]} : vector<2x96xf32> to vector<2x32xf32>
    %373 = arith.addf %371, %372 : vector<2x32xf32>
    %374 = arith.negf %373 : vector<2x32xf32>
    %375 = math.exp %374 : vector<2x32xf32>
    %cst_75 = arith.constant 1.000000e+00 : f32
    %376 = vector.broadcast %cst_75 : f32 to vector<2x32xf32>
    %377 = arith.addf %376, %375 : vector<2x32xf32>
    %378 = arith.divf %376, %377 : vector<2x32xf32>
    %379 = vector.extract_strided_slice %361 {offsets = [0, 64], sizes = [2, 32], strides = [1, 1]} : vector<2x96xf32> to vector<2x32xf32>
    %380 = vector.extract_strided_slice %362 {offsets = [0, 64], sizes = [2, 32], strides = [1, 1]} : vector<2x96xf32> to vector<2x32xf32>
    %381 = vector.broadcast %5 : vector<1x32xf32> to vector<2x32xf32>
    %382 = arith.addf %380, %381 : vector<2x32xf32>
    %383 = arith.mulf %370, %382 : vector<2x32xf32>
    %384 = arith.addf %379, %383 : vector<2x32xf32>
    %385 = math.tanh %384 : vector<2x32xf32>
    %cst_76 = arith.constant 1.000000e+00 : f32
    %386 = vector.broadcast %cst_76 : f32 to vector<2x32xf32>
    %387 = arith.subf %386, %378 : vector<2x32xf32>
    %388 = arith.mulf %387, %385 : vector<2x32xf32>
    %389 = arith.mulf %378, %326 : vector<2x32xf32>
    %390 = arith.addf %388, %389 : vector<2x32xf32>
    %c6_i32 = arith.constant 6 : i32
    %391 = arith.index_cast %c6_i32 : i32 to index
    %c0_77 = arith.constant 0 : index
    %c0_78 = arith.constant 0 : index
    %392 = vector.load %arg0[%391, %c0_77, %c0_78] : memref<8x2x96xf32, #tpu.memory_space<vmem>>, vector<1x2x96xf32>
    %393 = vector.shape_cast %392 : vector<1x2x96xf32> to vector<2x96xf32>
    %cst_79 = arith.constant dense<0.000000e+00> : vector<2x96xf32>
    %394 = tpu.matmul %358, %0, %cst_79 {dimension_numbers = #tpu.dot_dimension_numbers<[1], [0], [0], [1], [0, 0, 1, 1], [], []>} : vector<2x32xf32>, vector<32x96xf32>, vector<2x96xf32> -> vector<2x96xf32>
    %395 = vector.extract_strided_slice %393 {offsets = [0, 0], sizes = [2, 32], strides = [1, 1]} : vector<2x96xf32> to vector<2x32xf32>
    %396 = vector.extract_strided_slice %394 {offsets = [0, 0], sizes = [2, 32], strides = [1, 1]} : vector<2x96xf32> to vector<2x32xf32>
    %397 = arith.addf %395, %396 : vector<2x32xf32>
    %398 = arith.negf %397 : vector<2x32xf32>
    %399 = math.exp %398 : vector<2x32xf32>
    %cst_80 = arith.constant 1.000000e+00 : f32
    %400 = vector.broadcast %cst_80 : f32 to vector<2x32xf32>
    %401 = arith.addf %400, %399 : vector<2x32xf32>
    %402 = arith.divf %400, %401 : vector<2x32xf32>
    %403 = vector.extract_strided_slice %393 {offsets = [0, 32], sizes = [2, 32], strides = [1, 1]} : vector<2x96xf32> to vector<2x32xf32>
    %404 = vector.extract_strided_slice %394 {offsets = [0, 32], sizes = [2, 32], strides = [1, 1]} : vector<2x96xf32> to vector<2x32xf32>
    %405 = arith.addf %403, %404 : vector<2x32xf32>
    %406 = arith.negf %405 : vector<2x32xf32>
    %407 = math.exp %406 : vector<2x32xf32>
    %cst_81 = arith.constant 1.000000e+00 : f32
    %408 = vector.broadcast %cst_81 : f32 to vector<2x32xf32>
    %409 = arith.addf %408, %407 : vector<2x32xf32>
    %410 = arith.divf %408, %409 : vector<2x32xf32>
    %411 = vector.extract_strided_slice %393 {offsets = [0, 64], sizes = [2, 32], strides = [1, 1]} : vector<2x96xf32> to vector<2x32xf32>
    %412 = vector.extract_strided_slice %394 {offsets = [0, 64], sizes = [2, 32], strides = [1, 1]} : vector<2x96xf32> to vector<2x32xf32>
    %413 = vector.broadcast %3 : vector<1x32xf32> to vector<2x32xf32>
    %414 = arith.addf %412, %413 : vector<2x32xf32>
    %415 = arith.mulf %402, %414 : vector<2x32xf32>
    %416 = arith.addf %411, %415 : vector<2x32xf32>
    %417 = math.tanh %416 : vector<2x32xf32>
    %cst_82 = arith.constant 1.000000e+00 : f32
    %418 = vector.broadcast %cst_82 : f32 to vector<2x32xf32>
    %419 = arith.subf %418, %410 : vector<2x32xf32>
    %420 = arith.mulf %419, %417 : vector<2x32xf32>
    %421 = arith.mulf %410, %358 : vector<2x32xf32>
    %422 = arith.addf %420, %421 : vector<2x32xf32>
    %cst_83 = arith.constant dense<0.000000e+00> : vector<2x96xf32>
    %423 = tpu.matmul %422, %1, %cst_83 {dimension_numbers = #tpu.dot_dimension_numbers<[1], [0], [0], [1], [0, 0, 1, 1], [], []>} : vector<2x32xf32>, vector<32x96xf32>, vector<2x96xf32> -> vector<2x96xf32>
    %424 = vector.broadcast %4 : vector<1x96xf32> to vector<2x96xf32>
    %425 = arith.addf %423, %424 : vector<2x96xf32>
    %cst_84 = arith.constant dense<0.000000e+00> : vector<2x96xf32>
    %426 = tpu.matmul %390, %2, %cst_84 {dimension_numbers = #tpu.dot_dimension_numbers<[1], [0], [0], [1], [0, 0, 1, 1], [], []>} : vector<2x32xf32>, vector<32x96xf32>, vector<2x96xf32> -> vector<2x96xf32>
    %427 = vector.extract_strided_slice %425 {offsets = [0, 0], sizes = [2, 32], strides = [1, 1]} : vector<2x96xf32> to vector<2x32xf32>
    %428 = vector.extract_strided_slice %426 {offsets = [0, 0], sizes = [2, 32], strides = [1, 1]} : vector<2x96xf32> to vector<2x32xf32>
    %429 = arith.addf %427, %428 : vector<2x32xf32>
    %430 = arith.negf %429 : vector<2x32xf32>
    %431 = math.exp %430 : vector<2x32xf32>
    %cst_85 = arith.constant 1.000000e+00 : f32
    %432 = vector.broadcast %cst_85 : f32 to vector<2x32xf32>
    %433 = arith.addf %432, %431 : vector<2x32xf32>
    %434 = arith.divf %432, %433 : vector<2x32xf32>
    %435 = vector.extract_strided_slice %425 {offsets = [0, 32], sizes = [2, 32], strides = [1, 1]} : vector<2x96xf32> to vector<2x32xf32>
    %436 = vector.extract_strided_slice %426 {offsets = [0, 32], sizes = [2, 32], strides = [1, 1]} : vector<2x96xf32> to vector<2x32xf32>
    %437 = arith.addf %435, %436 : vector<2x32xf32>
    %438 = arith.negf %437 : vector<2x32xf32>
    %439 = math.exp %438 : vector<2x32xf32>
    %cst_86 = arith.constant 1.000000e+00 : f32
    %440 = vector.broadcast %cst_86 : f32 to vector<2x32xf32>
    %441 = arith.addf %440, %439 : vector<2x32xf32>
    %442 = arith.divf %440, %441 : vector<2x32xf32>
    %443 = vector.extract_strided_slice %425 {offsets = [0, 64], sizes = [2, 32], strides = [1, 1]} : vector<2x96xf32> to vector<2x32xf32>
    %444 = vector.extract_strided_slice %426 {offsets = [0, 64], sizes = [2, 32], strides = [1, 1]} : vector<2x96xf32> to vector<2x32xf32>
    %445 = vector.broadcast %5 : vector<1x32xf32> to vector<2x32xf32>
    %446 = arith.addf %444, %445 : vector<2x32xf32>
    %447 = arith.mulf %434, %446 : vector<2x32xf32>
    %448 = arith.addf %443, %447 : vector<2x32xf32>
    %449 = math.tanh %448 : vector<2x32xf32>
    %cst_87 = arith.constant 1.000000e+00 : f32
    %450 = vector.broadcast %cst_87 : f32 to vector<2x32xf32>
    %451 = arith.subf %450, %442 : vector<2x32xf32>
    %452 = arith.mulf %451, %449 : vector<2x32xf32>
    %453 = arith.mulf %442, %390 : vector<2x32xf32>
    %454 = arith.addf %452, %453 : vector<2x32xf32>
    %c7_i32 = arith.constant 7 : i32
    %455 = arith.index_cast %c7_i32 : i32 to index
    %c0_88 = arith.constant 0 : index
    %c0_89 = arith.constant 0 : index
    %456 = vector.load %arg0[%455, %c0_88, %c0_89] : memref<8x2x96xf32, #tpu.memory_space<vmem>>, vector<1x2x96xf32>
    %457 = vector.shape_cast %456 : vector<1x2x96xf32> to vector<2x96xf32>
    %cst_90 = arith.constant dense<0.000000e+00> : vector<2x96xf32>
    %458 = tpu.matmul %422, %0, %cst_90 {dimension_numbers = #tpu.dot_dimension_numbers<[1], [0], [0], [1], [0, 0, 1, 1], [], []>} : vector<2x32xf32>, vector<32x96xf32>, vector<2x96xf32> -> vector<2x96xf32>
    %459 = vector.extract_strided_slice %457 {offsets = [0, 0], sizes = [2, 32], strides = [1, 1]} : vector<2x96xf32> to vector<2x32xf32>
    %460 = vector.extract_strided_slice %458 {offsets = [0, 0], sizes = [2, 32], strides = [1, 1]} : vector<2x96xf32> to vector<2x32xf32>
    %461 = arith.addf %459, %460 : vector<2x32xf32>
    %462 = arith.negf %461 : vector<2x32xf32>
    %463 = math.exp %462 : vector<2x32xf32>
    %cst_91 = arith.constant 1.000000e+00 : f32
    %464 = vector.broadcast %cst_91 : f32 to vector<2x32xf32>
    %465 = arith.addf %464, %463 : vector<2x32xf32>
    %466 = arith.divf %464, %465 : vector<2x32xf32>
    %467 = vector.extract_strided_slice %457 {offsets = [0, 32], sizes = [2, 32], strides = [1, 1]} : vector<2x96xf32> to vector<2x32xf32>
    %468 = vector.extract_strided_slice %458 {offsets = [0, 32], sizes = [2, 32], strides = [1, 1]} : vector<2x96xf32> to vector<2x32xf32>
    %469 = arith.addf %467, %468 : vector<2x32xf32>
    %470 = arith.negf %469 : vector<2x32xf32>
    %471 = math.exp %470 : vector<2x32xf32>
    %cst_92 = arith.constant 1.000000e+00 : f32
    %472 = vector.broadcast %cst_92 : f32 to vector<2x32xf32>
    %473 = arith.addf %472, %471 : vector<2x32xf32>
    %474 = arith.divf %472, %473 : vector<2x32xf32>
    %475 = vector.extract_strided_slice %457 {offsets = [0, 64], sizes = [2, 32], strides = [1, 1]} : vector<2x96xf32> to vector<2x32xf32>
    %476 = vector.extract_strided_slice %458 {offsets = [0, 64], sizes = [2, 32], strides = [1, 1]} : vector<2x96xf32> to vector<2x32xf32>
    %477 = vector.broadcast %3 : vector<1x32xf32> to vector<2x32xf32>
    %478 = arith.addf %476, %477 : vector<2x32xf32>
    %479 = arith.mulf %466, %478 : vector<2x32xf32>
    %480 = arith.addf %475, %479 : vector<2x32xf32>
    %481 = math.tanh %480 : vector<2x32xf32>
    %cst_93 = arith.constant 1.000000e+00 : f32
    %482 = vector.broadcast %cst_93 : f32 to vector<2x32xf32>
    %483 = arith.subf %482, %474 : vector<2x32xf32>
    %484 = arith.mulf %483, %481 : vector<2x32xf32>
    %485 = arith.mulf %474, %422 : vector<2x32xf32>
    %486 = arith.addf %484, %485 : vector<2x32xf32>
    %cst_94 = arith.constant dense<0.000000e+00> : vector<2x96xf32>
    %487 = tpu.matmul %486, %1, %cst_94 {dimension_numbers = #tpu.dot_dimension_numbers<[1], [0], [0], [1], [0, 0, 1, 1], [], []>} : vector<2x32xf32>, vector<32x96xf32>, vector<2x96xf32> -> vector<2x96xf32>
    %488 = vector.broadcast %4 : vector<1x96xf32> to vector<2x96xf32>
    %489 = arith.addf %487, %488 : vector<2x96xf32>
    %cst_95 = arith.constant dense<0.000000e+00> : vector<2x96xf32>
    %490 = tpu.matmul %454, %2, %cst_95 {dimension_numbers = #tpu.dot_dimension_numbers<[1], [0], [0], [1], [0, 0, 1, 1], [], []>} : vector<2x32xf32>, vector<32x96xf32>, vector<2x96xf32> -> vector<2x96xf32>
    %491 = vector.extract_strided_slice %489 {offsets = [0, 0], sizes = [2, 32], strides = [1, 1]} : vector<2x96xf32> to vector<2x32xf32>
    %492 = vector.extract_strided_slice %490 {offsets = [0, 0], sizes = [2, 32], strides = [1, 1]} : vector<2x96xf32> to vector<2x32xf32>
    %493 = arith.addf %491, %492 : vector<2x32xf32>
    %494 = arith.negf %493 : vector<2x32xf32>
    %495 = math.exp %494 : vector<2x32xf32>
    %cst_96 = arith.constant 1.000000e+00 : f32
    %496 = vector.broadcast %cst_96 : f32 to vector<2x32xf32>
    %497 = arith.addf %496, %495 : vector<2x32xf32>
    %498 = arith.divf %496, %497 : vector<2x32xf32>
    %499 = vector.extract_strided_slice %489 {offsets = [0, 32], sizes = [2, 32], strides = [1, 1]} : vector<2x96xf32> to vector<2x32xf32>
    %500 = vector.extract_strided_slice %490 {offsets = [0, 32], sizes = [2, 32], strides = [1, 1]} : vector<2x96xf32> to vector<2x32xf32>
    %501 = arith.addf %499, %500 : vector<2x32xf32>
    %502 = arith.negf %501 : vector<2x32xf32>
    %503 = math.exp %502 : vector<2x32xf32>
    %cst_97 = arith.constant 1.000000e+00 : f32
    %504 = vector.broadcast %cst_97 : f32 to vector<2x32xf32>
    %505 = arith.addf %504, %503 : vector<2x32xf32>
    %506 = arith.divf %504, %505 : vector<2x32xf32>
    %507 = vector.extract_strided_slice %489 {offsets = [0, 64], sizes = [2, 32], strides = [1, 1]} : vector<2x96xf32> to vector<2x32xf32>
    %508 = vector.extract_strided_slice %490 {offsets = [0, 64], sizes = [2, 32], strides = [1, 1]} : vector<2x96xf32> to vector<2x32xf32>
    %509 = vector.broadcast %5 : vector<1x32xf32> to vector<2x32xf32>
    %510 = arith.addf %508, %509 : vector<2x32xf32>
    %511 = arith.mulf %498, %510 : vector<2x32xf32>
    %512 = arith.addf %507, %511 : vector<2x32xf32>
    %513 = math.tanh %512 : vector<2x32xf32>
    %cst_98 = arith.constant 1.000000e+00 : f32
    %514 = vector.broadcast %cst_98 : f32 to vector<2x32xf32>
    %515 = arith.subf %514, %506 : vector<2x32xf32>
    %516 = arith.mulf %515, %513 : vector<2x32xf32>
    %517 = arith.mulf %506, %454 : vector<2x32xf32>
    %518 = arith.addf %516, %517 : vector<2x32xf32>
    %c8_i32 = arith.constant 8 : i32
    %c0_99 = arith.constant 0 : index
    %c0_100 = arith.constant 0 : index
    %519 = vector.load %arg7[%c0_99, %c0_100] : memref<32x128xf32, #tpu.memory_space<vmem>>, vector<32x128xf32>
    %cst_101 = arith.constant dense<0.000000e+00> : vector<2x128xf32>
    %520 = tpu.matmul %518, %519, %cst_101 {dimension_numbers = #tpu.dot_dimension_numbers<[1], [0], [0], [1], [0, 0, 1, 1], [], []>} : vector<2x32xf32>, vector<32x128xf32>, vector<2x128xf32> -> vector<2x128xf32>
    %c0_102 = arith.constant 0 : index
    %c0_103 = arith.constant 0 : index
    %521 = vector.load %arg8[%c0_102, %c0_103] : memref<1x128xf32, #tpu.memory_space<vmem>>, vector<1x128xf32>
    %522 = vector.broadcast %521 : vector<1x128xf32> to vector<2x128xf32>
    %523 = arith.addf %520, %522 : vector<2x128xf32>
    %cst_104 = arith.constant 0.000000e+00 : f32
    %524 = vector.broadcast %cst_104 : f32 to vector<2x128xf32>
    %525 = arith.maximumf %523, %524 : vector<2x128xf32>
    %c0_105 = arith.constant 0 : index
    %c0_106 = arith.constant 0 : index
    %526 = vector.load %arg9[%c0_105, %c0_106] : memref<2x128xf32, #tpu.memory_space<vmem>>, vector<2x128xf32>
    tpu.vector_store %arg9[%c0_105, %c0_106], %525 {strides = array<i32>} : memref<2x128xf32, #tpu.memory_space<vmem>>, vector<2x128xf32>,
    return
  }
}

</mosaic_0001>

<bundles_post_ra>
// kernel: gru_net_forward.1
= control target key start
LH: loop header
LB: loop body
LE: loop exit
PB: predicated region body
PF: predicated region fallthrough
CT: control target
= control target key end

     0   :  { %14 = vsyncpa [#allocation3], 0  ;;  %s3634_s0 = inlined_call_operand.vmem [shape: f32[8,2,96], index: 0, kind: input, shape index: {}]   ;;  %s3635_s1 = inlined_call_operand.vmem [shape: f32[32,96], index: 1, kind: input, shape index: {}]   ;;  %s3636_s2 = inlined_call_operand.vmem [shape: f32[1,32], index: 2, kind: input, shape index: {}]   ;;  %s3637_s3 = inlined_call_operand.vmem [shape: f32[32,96], index: 3, kind: input, shape index: {}]   ;;  %s3638_s4 = inlined_call_operand.vmem [shape: f32[1,96], index: 4, kind: input, shape index: {}]   ;;  %s3639_s5 = inlined_call_operand.vmem [shape: f32[32,96], index: 5, kind: input, shape index: {}]   ;;  %s3640_s6 = inlined_call_operand.vmem [shape: f32[1,32], index: 6, kind: input, shape index: {}]   ;;  %s3641_s7 = inlined_call_operand.hbm [shape: f32[32,128], index: 7, kind: input, shape index: {}]   ;;  %s3642_s8 = inlined_call_operand.vmem [shape: f32[1,128], index: 8, kind: input, shape index: {}]   ;;  %s3643_s9 = inlined_call_operand.hbm [shape: f32[2,128], index: 9, kind: output, shape index: {}]  }
   0x1   :  { %15 = vsyncpa [#allocation4], 0  ;;  %s3146_s30 = smov [#allocation2]   ;;  %s3098_s13 = scalar_lea.hbm %s3641_s7, 512 }
   0x2   :  { %s35_s10 = sshll.u32 %s3146_s30, 4  ;;  %p3099_p0 = scmp.ne.s32.totalorder %s3641_s7, %s3098_s13  ;;  %s36_s10 = int_to_ptr.vmem [resolvable:$true] %s35_s10 }
   0x3   :  { %p3102_p1 = scmp.lt.u32.totalorder %s3098_s13, %s3641_s7 }
   0x5   :  { %p3104_p2 = pnand %p3102_p1, %p3099_p0 }
   0x7   :  { %3107 = shalt.err (!%p3104_p2)
}
   0x8   :  { %s3108_s18 = scalar_lea.vmem %s36_s10, 512  ;;  %p3113_p4 = scmp.lt.s32.totalorder %s36_s10, %s36_s10 }
   0x9   :  { %p3109_p3 = scmp.ne.s32.totalorder %s36_s10, %s3108_s18  ;;  %p3114_p5 = scmp.lt.s32.totalorder %s3108_s18, %s3108_s18 }
   0xb   :  { %p3115_p6 = por %p3114_p5, %p3113_p4 }
   0xd   :  { %p3116_p7 = pnand %p3115_p6, %p3109_p3 }
   0xf   :  { %3119 = shalt.err (!%p3116_p7)
}
  0x10   :  { %s3147_s19 = smov 128   ;;  %s3148_s20 = smov 8  }
  0x11   :  { %41 = dma.hbm_to_vmem [thread:$0]  %s3641_s7, 512, %s36_s10, [#allocation3], %s3147_s19, %s3147_s19, %s3148_s20  }
  0x12   :  { %3142 = dma.done.wait [#allocation3], 512  }
  0x13   :  { %3143 = vsyncadd [#allocation3], 4294966784  ;;  %v3149_v0 = vmov 0.0|0.0   ;;  %vm3150_vm0 = vmmov 0   ;;  %v3151_v1 = vmov 0.0   ;;  %v47_v2 = vld [vmem:[%s3635_s1] sm:$0xff] }
  0x14   :  { %2843 = vmatprep.subr.bf16.mxu0 %v3149_v0  ;;  %2576 = vmatprep.mubr.msk.f32.mxu0 %vm3150_vm0, %v3151_v1  ;;  %v48_v3 = vld [vmem:[%s3635_s1 + $0x8] sm:$0xff]  ;;  %v49_v4 = vld [vmem:[%s3635_s1 + $0x10] sm:$0xff]  ;;  %v50_v6 = vld [vmem:[%s3635_s1 + $0x18] sm:$0xff]  ;;  %s3152_s11 = smov 64   ;;  %vm63_vm1 = vcmask 261120   ;;  %s3154_s20 = smov [#allocation5]  }
  0x15   :  { %2849 = vmatprep.subr.bf16.mxu1 %v3149_v0  ;;  %2587 = vmatprep.mubr.msk.f32.mxu1 %vm3150_vm0, %v3151_v1  ;;  %v3232_v5 = vpack.c.bf16 %v48_v3, %v47_v2  ;;  %v2394_v7 = vld [vmem:[%s3636_s2] ss:$0 sm:$0xff]  ;;  %v3242_v8 = vpack.c.bf16 %v50_v6, %v49_v4  ;;  %v56_v24 = vld [vmem:[%s3639_s5 + $0x8] sm:$0xff]  ;;  %v57_v25 = vld [vmem:[%s3639_s5 + $0x10] sm:$0xff]  ;;  %s2384_s21 = sshll.u32 %s3154_s20, 4  ;;  %s2385_s21 = int_to_ptr.vmem [resolvable:$true] %s2384_s21 }
  0x16   :  { %149 = vrot.lane.b32.xlu0 %v2394_v7, %s3152_s11  ;;  %v62_v13 = vld [vmem:[%s3634_s0] sm:$0x3]  ;;  %v58_v27 = vld [vmem:[%s3639_s5 + $0x18] sm:$0xff]  ;;  %v52_v29 = vld [vmem:[%s3637_s3 + $0x8] sm:$0xff]  ;;  %s3120_s22 = scalar_lea.vmem %s2385_s21, 32  ;;  %p3125_p9 = scmp.lt.s32.totalorder %s2385_s21, %s2385_s21 }
  0x17   :  { %2845 = vmatpush3.bf16.msra.mxu0 %v3232_v5  ;;  %v55_v23 = vld [vmem:[%s3639_s5] sm:$0xff]  ;;  %v53_v31 = vld [vmem:[%s3637_s3 + $0x10] sm:$0xff]  ;;  %v54_v32 = vld [vmem:[%s3637_s3 + $0x18] sm:$0xff]  ;;  %v3287_v33 = vpack.c.bf16 %v58_v27, %v57_v25  ;;  %p3121_p8 = scmp.ne.s32.totalorder %s2385_s21, %s3120_s22  ;;  %p3126_p10 = scmp.lt.s32.totalorder %s3120_s22, %s3120_s22 }
  0x18   :  { %2846 = vmatprep.subr.bf16.mxu0 %v3149_v0  ;;  %v3267_v26 = vpack.c.bf16 %v56_v24, %v55_v23  ;;  %v51_v28 = vld [vmem:[%s3637_s3] sm:$0xff]  ;;  %v3291_v34 = vpack.c.bf16 %v54_v32, %v53_v31  ;;  %s3153_s3 = smov 96  }
  0x19   :  { %v3278_v30 = vpack.c.bf16 %v52_v29, %v51_v28  ;;  %v2398_v38 = vld [vmem:[%s3640_s6] ss:$0 sm:$0xff]  ;;  %v2399_v61 = vld [vmem:[%s3634_s0 + $0x2] sm:$0x3]  ;;  %p3127_p11 = por %p3126_p10, %p3125_p9 }
  0x1a   :  { %v3335_v47 = vld [vmem:[%s3638_s4] ss:$0 sm:$0xff] }
  0x1b   :  { %2848 = vmatpush3.bf16.msra.mxu0 %v3242_v8  ;;  %2851 = vmatpush3.bf16.msra.mxu1 %v3278_v30  ;;  %p3128_p12 = pnand %p3127_p11, %p3121_p8 }
  0x1c   :  { %2855 = vmatprep.subr.bf16.mxu0 %v3149_v0  ;;  %2852 = vmatprep.subr.bf16.mxu1 %v3149_v0 }
  0x1e   :  { %2577 = vmatmul.mubr.f32.vlgmr.msra.gmra.mrb[0].mxu0 %v3151_v1 }
  0x1f   :  { %2598 = vmatprep.mubr.msk.f32.mxu0 %vm3150_vm0, %v3151_v1  ;;  %2857 = vmatpush3.bf16.msra.mxu0 %v3267_v26 }
  0x20   :  { %2858 = vmatprep.subr.bf16.mxu0 %v3149_v0  ;;  %2854 = vmatpush3.bf16.msra.mxu1 %v3291_v34 }
  0x21   :  { %2861 = vmatprep.subr.bf16.mxu1 %v3149_v0 }
  0x23   :  { %2860 = vmatpush3.bf16.msra.mxu0 %v3287_v33 }
  0x24   :  { %2867 = vmatprep.subr.bf16.mxu0 %v3149_v0 }
  0x26   :  { %2599 = vmatmul.mubr.f32.vlgmr.msra.gmra.mrb[2].mxu0 %v3151_v1 }
  0x27   :  { %2869 = vmatpush3.bf16.msra.mxu0 %v3278_v30  ;;  %2620 = vmatprep.mubr.msk.f32.mxu0 %vm3150_vm0, %v3151_v1 }
  0x28   :  { %2870 = vmatprep.subr.bf16.mxu0 %v3149_v0 }
  0x2b   :  { %2872 = vmatpush3.bf16.msra.mxu0 %v3291_v34 }
  0x2c   :  { %2879 = vmatprep.subr.bf16.mxu0 %v3149_v0 }
  0x88   :  { %v3250_v9 = vpop.permute.xlu0 %149 }
  0xf1   :  { %v133_v10 = vpop.f32.mrb[0].mxu0 }
  0xf2   :  { %v152_v11 = vadd.f32 %v3250_v9, %v133_v10  ;;  %v2578_v12 = vpop.f32.mrb[1].mxu0  ;;  %v137_v14 = vadd.f32 %v133_v10, %v62_v13 }
  0xf4   :  { %154 = vrot.lane.b32.xlu0 %v152_v11, %s3152_s11  ;;  %v2393_v15 = vmul.f32 -1.442695, %v137_v14 }
  0xf6   :  { %3002 = vpow2.f32 %v2393_v15 }
  0xf9   :  { %v319_v42 = vpop.f32.mrb[2].mxu0 }
  0xfa   :  { %v2600_v43 = vpop.f32.mrb[3].mxu0 }
 0x100   :  { %v3003_v16 = vpop.eup %3002 }
 0x101   :  { %v141_v17 = vadd.f32 1.0, %v3003_v16 }
 0x103   :  { %3004 = vrcp.f32 %v141_v17 }
 0x10d   :  { %v3005_v18 = vpop.eup %3004 }
 0x10e   :  { %v164_v36 = vsub.f32 1.0, %v3005_v18  ;;  %v170_v39 = vmul.f32 0.0, %v3005_v18 }
 0x166   :  { %v155_v19 = vpop.permute.xlu0 %154 }
 0x167   :  { %v157_v20 = vmul.f32 %v3005_v18, %v155_v19 }
 0x169   :  { %159 = vrot.lane.b32.xlu1 %v157_v20, %s3152_s11 }
 0x1db   :  { %v160_v21 = vpop.permute.xlu1 %159 }
 0x1dc   :  { %v162_v22 = vadd.f32 %v160_v21, %v62_v13 }
 0x1de   :  { %3006 = vtanh.f32 %v162_v22 }
 0x1e8   :  { %v3007_v35 = vpop.eup %3006 }
 0x1e9   :  { %166 = vrot.lane.b32.xlu1 %v3007_v35, %s3153_s3 }
 0x1ed   :  { %335 = vrot.lane.b32.xlu1 %v2398_v38, %s3152_s11 }
 0x25b   :  { %v167_v37 = vpop.permute.xlu1 %166 }
 0x25c   :  { %v169_v40 = vmul.f32 %v167_v37, %v164_v36 }
 0x25e   :  { %v3310_v41 = vadd.f32 %v170_v39, %v169_v40 }
 0x25f   :  { %v3314_v44 = vpop.permute.xlu1 %335 }
 0x260   :  { %179 = vrot.lane.b32.xlu0 %v3310_v41, %s3153_s3  ;;  %v338_v45 = vadd.f32 %v3314_v44, %v319_v42 }
 0x262   :  { %340 = vrot.lane.b32.xlu1 %v338_v45, %s3152_s11 }
 0x2d2   :  { %v180_v46 = vpop.permute.xlu0 %179 }
 0x2d3   :  { %2588 = vmatmul.mubr.msk.f32.vlgmr.msra.gmra.mrb[0].mxu1 %vm63_vm1, %v180_v46 }
 0x2d4   :  { %2863 = vmatpush3.bf16.msra.mxu1 %v3232_v5  ;;  %2609 = vmatprep.mubr.msk.f32.mxu1 %vm3150_vm0, %v3151_v1  ;;  %v341_v58 = vpop.permute.xlu1 %340 }
 0x2d5   :  { %2864 = vmatprep.subr.bf16.mxu1 %v3149_v0 }
 0x2d8   :  { %2866 = vmatpush3.bf16.msra.mxu1 %v3242_v8 }
 0x2d9   :  { %2873 = vmatprep.subr.bf16.mxu1 %v3149_v0 }
 0x2db   :  { %2610 = vmatmul.mubr.msk.f32.vlgmr.msra.gmra.mrb[2].mxu1 %vm63_vm1, %v180_v46 }
 0x2dc   :  { %2875 = vmatpush3.bf16.msra.mxu1 %v3267_v26  ;;  %2631 = vmatprep.mubr.msk.f32.mxu1 %vm3150_vm0, %v3151_v1 }
 0x2dd   :  { %2876 = vmatprep.subr.bf16.mxu1 %v3149_v0 }
 0x2e0   :  { %2878 = vmatpush3.bf16.msra.mxu1 %v3287_v33 }
 0x2e1   :  { %2885 = vmatprep.subr.bf16.mxu1 %v3149_v0 }
 0x3a6   :  { %v249_v48 = vpop.f32.mrb[0].mxu1 }
 0x3a7   :  { %v250_v49 = vadd.f32 %v3335_v47, %v249_v48  ;;  %v2589_v50 = vpop.f32.mrb[1].mxu1 }
 0x3a8   :  { %v2405_v50 = vld [vmem:[%s3634_s0 + $0x4] sm:$0x3] }
 0x3a9   :  { %v323_v51 = vadd.f32 %v319_v42, %v250_v49 }
 0x3ab   :  { %v2397_v52 = vmul.f32 -1.442695, %v323_v51 }
 0x3ad   :  { %3008 = vpow2.f32 %v2397_v52 }
 0x3ae   :  { %v426_v53 = vpop.f32.mrb[2].mxu1 }
 0x3af   :  { %v437_v54 = vadd.f32 %v426_v53, %v3250_v9  ;;  %v2611_v55 = vpop.f32.mrb[3].mxu1  ;;  %v430_v62 = vadd.f32 %v2399_v61, %v426_v53 }
 0x3b1   :  { %439 = vrot.lane.b32.xlu0 %v437_v54, %s3152_s11  ;;  %v2401_v63 = vmul.f32 -1.442695, %v430_v62 }
 0x3b7   :  { %v3009_v56 = vpop.eup %3008 }
 0x3b8   :  { %v327_v57 = vadd.f32 1.0, %v3009_v56 }
 0x3ba   :  { %3010 = vrcp.f32 %v327_v57 }
 0x3bb   :  { %3012 = vpow2.f32 %v2401_v63 }
 0x3c4   :  { %v3011_v59 = vpop.eup %3010 }
 0x3c5   :  { %v343_v60 = vmul.f32 %v3011_v59, %v341_v58  ;;  %v3013_v2 = vpop.eup %3012  ;;  %v350_v16 = vsub.f32 1.0, %v3011_v59  ;;  %v356_v18 = vmul.f32 0.0, %v3011_v59 }
 0x3c6   :  { %v434_v3 = vadd.f32 1.0, %v3013_v2 }
 0x3c7   :  { %345 = vrot.lane.b32.xlu1 %v343_v60, %s3152_s11 }
 0x3c8   :  { %3014 = vrcp.f32 %v434_v3 }
 0x3d2   :  { %v3015_v4 = vpop.eup %3014 }
 0x3d3   :  { %v449_v21 = vsub.f32 1.0, %v3015_v4  ;;  %v455_v23 = vmul.f32 %v3015_v4, %v3310_v41 }
 0x423   :  { %v440_v6 = vpop.permute.xlu0 %439 }
 0x424   :  { %v442_v7 = vmul.f32 %v3015_v4, %v440_v6 }
 0x426   :  { %444 = vrot.lane.b32.xlu0 %v442_v7, %s3152_s11 }
 0x439   :  { %v346_v10 = vpop.permute.xlu1 %345 }
 0x43a   :  { %v348_v11 = vadd.f32 %v346_v10, %v250_v49 }
 0x43c   :  { %3016 = vtanh.f32 %v348_v11 }
 0x446   :  { %v3017_v12 = vpop.eup %3016 }
 0x447   :  { %352 = vrot.lane.b32.xlu1 %v3017_v12, %s3153_s3 }
 0x498   :  { %v445_v13 = vpop.permute.xlu0 %444 }
 0x499   :  { %v447_v14 = vadd.f32 %v2399_v61, %v445_v13 }
 0x49b   :  { %3018 = vtanh.f32 %v447_v14 }
 0x4a5   :  { %v3019_v15 = vpop.eup %3018 }
 0x4a6   :  { %451 = vrot.lane.b32.xlu0 %v3019_v15, %s3153_s3 }
 0x4b9   :  { %v353_v17 = vpop.permute.xlu1 %352 }
 0x4ba   :  { %v355_v19 = vmul.f32 %v353_v17, %v350_v16 }
 0x4bc   :  { %v3347_v20 = vadd.f32 %v356_v18, %v355_v19 }
 0x4be   :  { %533 = vrot.lane.b32.xlu1 %v3347_v20, %s3153_s3 }
 0x518   :  { %v452_v22 = vpop.permute.xlu0 %451 }
 0x519   :  { %v454_v24 = vmul.f32 %v452_v22, %v449_v21 }
 0x51b   :  { %v3352_v25 = vadd.f32 %v455_v23, %v454_v24 }
 0x51d   :  { %458 = vrot.lane.b32.xlu0 %v3352_v25, %s3153_s3 }
 0x530   :  { %v534_v27 = vpop.permute.xlu1 %533 }
 0x531   :  { %2632 = vmatmul.mubr.msk.f32.vlgmr.msra.gmra.mrb[4].mxu1 %vm63_vm1, %v534_v27 }
 0x532   :  { %2887 = vmatpush3.bf16.msra.mxu1 %v3278_v30  ;;  %2653 = vmatprep.mubr.msk.f32.mxu1 %vm3150_vm0, %v3151_v1 }
 0x533   :  { %2888 = vmatprep.subr.bf16.mxu1 %v3149_v0 }
 0x536   :  { %2890 = vmatpush3.bf16.msra.mxu1 %v3291_v34 }
 0x537   :  { %2897 = vmatprep.subr.bf16.mxu1 %v3149_v0 }
 0x58f   :  { %v459_v28 = vpop.permute.xlu0 %458 }
 0x590   :  { %2621 = vmatmul.mubr.msk.f32.vlgmr.msra.gmra.mrb[4].mxu0 %vm63_vm1, %v459_v28 }
 0x591   :  { %2881 = vmatpush3.bf16.msra.mxu0 %v3232_v5  ;;  %2642 = vmatprep.mubr.msk.f32.mxu0 %vm3150_vm0, %v3151_v1 }
 0x592   :  { %2882 = vmatprep.subr.bf16.mxu0 %v3149_v0 }
 0x595   :  { %2884 = vmatpush3.bf16.msra.mxu0 %v3242_v8 }
 0x596   :  { %2891 = vmatprep.subr.bf16.mxu0 %v3149_v0 }
 0x598   :  { %2643 = vmatmul.mubr.msk.f32.vlgmr.msra.gmra.mrb[6].mxu0 %vm63_vm1, %v459_v28 }
 0x599   :  { %2893 = vmatpush3.bf16.msra.mxu0 %v3267_v26  ;;  %2664 = vmatprep.mubr.msk.f32.mxu0 %vm3150_vm0, %v3151_v1 }
 0x59a   :  { %2894 = vmatprep.subr.bf16.mxu0 %v3149_v0 }
 0x59d   :  { %2896 = vmatpush3.bf16.msra.mxu0 %v3287_v33 }
 0x59e   :  { %2903 = vmatprep.subr.bf16.mxu0 %v3149_v0 }
 0x604   :  { %v603_v29 = vpop.f32.mrb[4].mxu1 }
 0x605   :  { %v614_v31 = vadd.f32 %v603_v29, %v3314_v44  ;;  %v2633_v32 = vpop.f32.mrb[5].mxu1 }
 0x607   :  { %616 = vrot.lane.b32.xlu1 %v614_v31, %s3152_s11 }
 0x663   :  { %v528_v35 = vpop.f32.mrb[4].mxu0 }
 0x664   :  { %v529_v36 = vadd.f32 %v3335_v47, %v528_v35  ;;  %v2622_v37 = vpop.f32.mrb[5].mxu0 }
 0x665   :  { %v2411_v37 = vld [vmem:[%s3634_s0 + $0x6] sm:$0x3] }
 0x666   :  { %v607_v38 = vadd.f32 %v603_v29, %v529_v36 }
 0x668   :  { %v2404_v39 = vmul.f32 -1.442695, %v607_v38 }
 0x66a   :  { %3020 = vpow2.f32 %v2404_v39 }
 0x66b   :  { %v702_v40 = vpop.f32.mrb[6].mxu0 }
 0x66c   :  { %v713_v41 = vadd.f32 %v702_v40, %v3250_v9  ;;  %v2644_v42 = vpop.f32.mrb[7].mxu0  ;;  %v706_v51 = vadd.f32 %v2405_v50, %v702_v40 }
 0x66e   :  { %715 = vrot.lane.b32.xlu0 %v713_v41, %s3152_s11  ;;  %v2407_v52 = vmul.f32 -1.442695, %v706_v51 }
 0x674   :  { %v3021_v43 = vpop.eup %3020 }
 0x675   :  { %v611_v45 = vadd.f32 1.0, %v3021_v43 }
 0x677   :  { %3022 = vrcp.f32 %v611_v45 }
 0x678   :  { %3024 = vpow2.f32 %v2407_v52 }
 0x679   :  { %v617_v48 = vpop.permute.xlu1 %616 }
 0x681   :  { %v3023_v46 = vpop.eup %3022 }
 0x682   :  { %v619_v49 = vmul.f32 %v3023_v46, %v617_v48  ;;  %v3025_v53 = vpop.eup %3024  ;;  %v626_v2 = vsub.f32 1.0, %v3023_v46  ;;  %v632_v4 = vmul.f32 %v3023_v46, %v3347_v20 }
 0x683   :  { %v710_v54 = vadd.f32 1.0, %v3025_v53 }
 0x684   :  { %621 = vrot.lane.b32.xlu1 %v619_v49, %s3152_s11 }
 0x685   :  { %3026 = vrcp.f32 %v710_v54 }
 0x68f   :  { %v3027_v55 = vpop.eup %3026 }
 0x690   :  { %v725_v10 = vsub.f32 1.0, %v3027_v55  ;;  %v731_v12 = vmul.f32 %v3027_v55, %v3352_v25 }
 0x6e0   :  { %v716_v56 = vpop.permute.xlu0 %715 }
 0x6e1   :  { %v718_v57 = vmul.f32 %v3027_v55, %v716_v56 }
 0x6e3   :  { %720 = vrot.lane.b32.xlu0 %v718_v57, %s3152_s11 }
 0x6f6   :  { %v622_v58 = vpop.permute.xlu1 %621 }
 0x6f7   :  { %v624_v59 = vadd.f32 %v622_v58, %v529_v36 }
 0x6f9   :  { %3028 = vtanh.f32 %v624_v59 }
 0x703   :  { %v3029_v60 = vpop.eup %3028 }
 0x704   :  { %628 = vrot.lane.b32.xlu1 %v3029_v60, %s3153_s3 }
 0x755   :  { %v721_v61 = vpop.permute.xlu0 %720 }
 0x756   :  { %v723_v62 = vadd.f32 %v2405_v50, %v721_v61 }
 0x758   :  { %3030 = vtanh.f32 %v723_v62 }
 0x762   :  { %v3031_v63 = vpop.eup %3030 }
 0x763   :  { %727 = vrot.lane.b32.xlu0 %v3031_v63, %s3153_s3 }
 0x776   :  { %v629_v3 = vpop.permute.xlu1 %628 }
 0x777   :  { %v631_v6 = vmul.f32 %v629_v3, %v626_v2 }
 0x779   :  { %v3390_v7 = vadd.f32 %v632_v4, %v631_v6 }
 0x77b   :  { %809 = vrot.lane.b32.xlu1 %v3390_v7, %s3153_s3 }
 0x7d5   :  { %v728_v11 = vpop.permute.xlu0 %727 }
 0x7d6   :  { %v730_v13 = vmul.f32 %v728_v11, %v725_v10 }
 0x7d8   :  { %v3395_v14 = vadd.f32 %v731_v12, %v730_v13 }
 0x7da   :  { %734 = vrot.lane.b32.xlu0 %v3395_v14, %s3153_s3 }
 0x7ed   :  { %v810_v15 = vpop.permute.xlu1 %809 }
 0x7ee   :  { %2665 = vmatmul.mubr.msk.f32.vlgmr.msra.gmra.mrb[8].mxu0 %vm63_vm1, %v810_v15 }
 0x7ef   :  { %2905 = vmatpush3.bf16.msra.mxu0 %v3278_v30  ;;  %2686 = vmatprep.mubr.msk.f32.mxu0 %vm3150_vm0, %v3151_v1 }
 0x7f0   :  { %2906 = vmatprep.subr.bf16.mxu0 %v3149_v0 }
 0x7f3   :  { %2908 = vmatpush3.bf16.msra.mxu0 %v3291_v34 }
 0x7f4   :  { %2915 = vmatprep.subr.bf16.mxu0 %v3149_v0 }
 0x84c   :  { %v735_v16 = vpop.permute.xlu0 %734 }
 0x84d   :  { %2654 = vmatmul.mubr.msk.f32.vlgmr.msra.gmra.mrb[6].mxu1 %vm63_vm1, %v735_v16 }
 0x84e   :  { %2899 = vmatpush3.bf16.msra.mxu1 %v3232_v5  ;;  %2675 = vmatprep.mubr.msk.f32.mxu1 %vm3150_vm0, %v3151_v1 }
 0x84f   :  { %2900 = vmatprep.subr.bf16.mxu1 %v3149_v0 }
 0x852   :  { %2902 = vmatpush3.bf16.msra.mxu1 %v3242_v8 }
 0x853   :  { %2909 = vmatprep.subr.bf16.mxu1 %v3149_v0 }
 0x855   :  { %2676 = vmatmul.mubr.msk.f32.vlgmr.msra.gmra.mrb[8].mxu1 %vm63_vm1, %v735_v16 }
 0x856   :  { %2911 = vmatpush3.bf16.msra.mxu1 %v3267_v26  ;;  %2697 = vmatprep.mubr.msk.f32.mxu1 %vm3150_vm0, %v3151_v1 }
 0x857   :  { %2912 = vmatprep.subr.bf16.mxu1 %v3149_v0 }
 0x85a   :  { %2914 = vmatpush3.bf16.msra.mxu1 %v3287_v33 }
 0x85b   :  { %2921 = vmatprep.subr.bf16.mxu1 %v3149_v0 }
 0x8c1   :  { %v879_v17 = vpop.f32.mrb[8].mxu0 }
 0x8c2   :  { %v890_v18 = vadd.f32 %v879_v17, %v3314_v44  ;;  %v2666_v19 = vpop.f32.mrb[9].mxu0 }
 0x8c4   :  { %892 = vrot.lane.b32.xlu0 %v890_v18, %s3152_s11 }
 0x920   :  { %v804_v20 = vpop.f32.mrb[6].mxu1 }
 0x921   :  { %v805_v21 = vadd.f32 %v3335_v47, %v804_v20  ;;  %v2655_v22 = vpop.f32.mrb[7].mxu1 }
 0x922   :  { %v2417_v22 = vld [vmem:[%s3634_s0 + $0x8] sm:$0x3] }
 0x923   :  { %v883_v23 = vadd.f32 %v879_v17, %v805_v21 }
 0x925   :  { %v2410_v24 = vmul.f32 -1.442695, %v883_v23 }
 0x927   :  { %3032 = vpow2.f32 %v2410_v24 }
 0x928   :  { %v978_v25 = vpop.f32.mrb[8].mxu1 }
 0x929   :  { %v989_v27 = vadd.f32 %v978_v25, %v3250_v9  ;;  %v2677_v28 = vpop.f32.mrb[9].mxu1  ;;  %v982_v38 = vadd.f32 %v2411_v37, %v978_v25 }
 0x92b   :  { %991 = vrot.lane.b32.xlu1 %v989_v27, %s3152_s11  ;;  %v2413_v39 = vmul.f32 -1.442695, %v982_v38 }
 0x931   :  { %v3033_v29 = vpop.eup %3032 }
 0x932   :  { %v887_v31 = vadd.f32 1.0, %v3033_v29 }
 0x934   :  { %3034 = vrcp.f32 %v887_v31 }
 0x935   :  { %3036 = vpow2.f32 %v2413_v39 }
 0x936   :  { %v893_v35 = vpop.permute.xlu0 %892 }
 0x93e   :  { %v3035_v32 = vpop.eup %3034 }
 0x93f   :  { %v895_v36 = vmul.f32 %v3035_v32, %v893_v35  ;;  %v3037_v40 = vpop.eup %3036  ;;  %v902_v53 = vsub.f32 1.0, %v3035_v32  ;;  %v908_v55 = vmul.f32 %v3035_v32, %v3390_v7 }
 0x940   :  { %v986_v41 = vadd.f32 1.0, %v3037_v40 }
 0x941   :  { %897 = vrot.lane.b32.xlu0 %v895_v36, %s3152_s11 }
 0x942   :  { %3038 = vrcp.f32 %v986_v41 }
 0x94c   :  { %v3039_v42 = vpop.eup %3038 }
 0x94d   :  { %v1001_v58 = vsub.f32 1.0, %v3039_v42  ;;  %v1007_v60 = vmul.f32 %v3039_v42, %v3395_v14 }
 0x99d   :  { %v992_v43 = vpop.permute.xlu1 %991 }
 0x99e   :  { %v994_v45 = vmul.f32 %v3039_v42, %v992_v43 }
 0x9a0   :  { %996 = vrot.lane.b32.xlu1 %v994_v45, %s3152_s11 }
 0x9b3   :  { %v898_v46 = vpop.permute.xlu0 %897 }
 0x9b4   :  { %v900_v48 = vadd.f32 %v898_v46, %v805_v21 }
 0x9b6   :  { %3040 = vtanh.f32 %v900_v48 }
 0x9c0   :  { %v3041_v49 = vpop.eup %3040 }
 0x9c1   :  { %904 = vrot.lane.b32.xlu0 %v3041_v49, %s3153_s3 }
 0xa12   :  { %v997_v50 = vpop.permute.xlu1 %996 }
 0xa13   :  { %v999_v51 = vadd.f32 %v2411_v37, %v997_v50 }
 0xa15   :  { %3042 = vtanh.f32 %v999_v51 }
 0xa1f   :  { %v3043_v52 = vpop.eup %3042 }
 0xa20   :  { %1003 = vrot.lane.b32.xlu1 %v3043_v52, %s3153_s3 }
 0xa33   :  { %v905_v54 = vpop.permute.xlu0 %904 }
 0xa34   :  { %v907_v56 = vmul.f32 %v905_v54, %v902_v53 }
 0xa36   :  { %v3433_v57 = vadd.f32 %v908_v55, %v907_v56 }
 0xa38   :  { %1085 = vrot.lane.b32.xlu0 %v3433_v57, %s3153_s3 }
 0xa92   :  { %v1004_v59 = vpop.permute.xlu1 %1003 }
 0xa93   :  { %v1006_v61 = vmul.f32 %v1004_v59, %v1001_v58 }
 0xa95   :  { %v3438_v62 = vadd.f32 %v1007_v60, %v1006_v61 }
 0xa97   :  { %1010 = vrot.lane.b32.xlu1 %v3438_v62, %s3153_s3 }
 0xaaa   :  { %v1086_v63 = vpop.permute.xlu0 %1085 }
 0xaab   :  { %2698 = vmatmul.mubr.msk.f32.vlgmr.msra.gmra.mrb[10].mxu1 %vm63_vm1, %v1086_v63 }
 0xaac   :  { %2923 = vmatpush3.bf16.msra.mxu1 %v3278_v30  ;;  %2719 = vmatprep.mubr.msk.f32.mxu1 %vm3150_vm0, %v3151_v1 }
 0xaad   :  { %2924 = vmatprep.subr.bf16.mxu1 %v3149_v0 }
 0xab0   :  { %2926 = vmatpush3.bf16.msra.mxu1 %v3291_v34 }
 0xab1   :  { %2933 = vmatprep.subr.bf16.mxu1 %v3149_v0 }
 0xb09   :  { %v1011_v2 = vpop.permute.xlu1 %1010 }
 0xb0a   :  { %2687 = vmatmul.mubr.msk.f32.vlgmr.msra.gmra.mrb[10].mxu0 %vm63_vm1, %v1011_v2 }
 0xb0b   :  { %2917 = vmatpush3.bf16.msra.mxu0 %v3232_v5  ;;  %2708 = vmatprep.mubr.msk.f32.mxu0 %vm3150_vm0, %v3151_v1 }
 0xb0c   :  { %2918 = vmatprep.subr.bf16.mxu0 %v3149_v0 }
 0xb0f   :  { %2920 = vmatpush3.bf16.msra.mxu0 %v3242_v8 }
 0xb10   :  { %2927 = vmatprep.subr.bf16.mxu0 %v3149_v0 }
 0xb12   :  { %2709 = vmatmul.mubr.msk.f32.vlgmr.msra.gmra.mrb[12].mxu0 %vm63_vm1, %v1011_v2 }
 0xb13   :  { %2929 = vmatpush3.bf16.msra.mxu0 %v3267_v26  ;;  %2730 = vmatprep.mubr.msk.f32.mxu0 %vm3150_vm0, %v3151_v1 }
 0xb14   :  { %2930 = vmatprep.subr.bf16.mxu0 %v3149_v0 }
 0xb17   :  { %2932 = vmatpush3.bf16.msra.mxu0 %v3287_v33 }
 0xb18   :  { %2939 = vmatprep.subr.bf16.mxu0 %v3149_v0 }
 0xb7e   :  { %v1155_v3 = vpop.f32.mrb[10].mxu1 }
 0xb7f   :  { %v1166_v4 = vadd.f32 %v1155_v3, %v3314_v44  ;;  %v2699_v6 = vpop.f32.mrb[11].mxu1 }
 0xb81   :  { %1168 = vrot.lane.b32.xlu0 %v1166_v4, %s3152_s11 }
 0xbdd   :  { %v1080_v7 = vpop.f32.mrb[10].mxu0 }
 0xbde   :  { %v1081_v10 = vadd.f32 %v3335_v47, %v1080_v7  ;;  %v2688_v11 = vpop.f32.mrb[11].mxu0 }
 0xbdf   :  { %v2423_v11 = vld [vmem:[%s3634_s0 + $0xa] sm:$0x3] }
 0xbe0   :  { %v1159_v12 = vadd.f32 %v1155_v3, %v1081_v10 }
 0xbe2   :  { %v2416_v13 = vmul.f32 -1.442695, %v1159_v12 }
 0xbe4   :  { %3044 = vpow2.f32 %v2416_v13 }
 0xbe5   :  { %v1254_v14 = vpop.f32.mrb[12].mxu0 }
 0xbe6   :  { %v1265_v15 = vadd.f32 %v1254_v14, %v3250_v9  ;;  %v2710_v16 = vpop.f32.mrb[13].mxu0  ;;  %v1258_v23 = vadd.f32 %v2417_v22, %v1254_v14 }
 0xbe8   :  { %1267 = vrot.lane.b32.xlu1 %v1265_v15, %s3152_s11  ;;  %v2419_v24 = vmul.f32 -1.442695, %v1258_v23 }
 0xbee   :  { %v3045_v17 = vpop.eup %3044 }
 0xbef   :  { %v1163_v18 = vadd.f32 1.0, %v3045_v17 }
 0xbf1   :  { %3046 = vrcp.f32 %v1163_v18 }
 0xbf2   :  { %3048 = vpow2.f32 %v2419_v24 }
 0xbf3   :  { %v1169_v20 = vpop.permute.xlu0 %1168 }
 0xbfb   :  { %v3047_v19 = vpop.eup %3046 }
 0xbfc   :  { %v1171_v21 = vmul.f32 %v3047_v19, %v1169_v20  ;;  %v3049_v25 = vpop.eup %3048  ;;  %v1178_v40 = vsub.f32 1.0, %v3047_v19  ;;  %v1184_v42 = vmul.f32 %v3047_v19, %v3433_v57 }
 0xbfd   :  { %v1262_v27 = vadd.f32 1.0, %v3049_v25 }
 0xbfe   :  { %1173 = vrot.lane.b32.xlu0 %v1171_v21, %s3152_s11 }
 0xbff   :  { %3050 = vrcp.f32 %v1262_v27 }
 0xc09   :  { %v3051_v28 = vpop.eup %3050 }
 0xc0a   :  { %v1277_v46 = vsub.f32 1.0, %v3051_v28  ;;  %v1283_v49 = vmul.f32 %v3051_v28, %v3438_v62 }
 0xc5a   :  { %v1268_v29 = vpop.permute.xlu1 %1267 }
 0xc5b   :  { %v1270_v31 = vmul.f32 %v3051_v28, %v1268_v29 }
 0xc5d   :  { %1272 = vrot.lane.b32.xlu1 %v1270_v31, %s3152_s11 }
 0xc70   :  { %v1174_v32 = vpop.permute.xlu0 %1173 }
 0xc71   :  { %v1176_v35 = vadd.f32 %v1174_v32, %v1081_v10 }
 0xc73   :  { %3052 = vtanh.f32 %v1176_v35 }
 0xc7d   :  { %v3053_v36 = vpop.eup %3052 }
 0xc7e   :  { %1180 = vrot.lane.b32.xlu0 %v3053_v36, %s3153_s3 }
 0xccf   :  { %v1273_v37 = vpop.permute.xlu1 %1272 }
 0xcd0   :  { %v1275_v38 = vadd.f32 %v2417_v22, %v1273_v37 }
 0xcd2   :  { %3054 = vtanh.f32 %v1275_v38 }
 0xcdc   :  { %v3055_v39 = vpop.eup %3054 }
 0xcdd   :  { %1279 = vrot.lane.b32.xlu1 %v3055_v39, %s3153_s3 }
 0xcf0   :  { %v1181_v41 = vpop.permute.xlu0 %1180 }
 0xcf1   :  { %v1183_v43 = vmul.f32 %v1181_v41, %v1178_v40 }
 0xcf3   :  { %v3476_v45 = vadd.f32 %v1184_v42, %v1183_v43 }
 0xcf5   :  { %1361 = vrot.lane.b32.xlu0 %v3476_v45, %s3153_s3 }
 0xd4f   :  { %v1280_v48 = vpop.permute.xlu1 %1279 }
 0xd50   :  { %v1282_v50 = vmul.f32 %v1280_v48, %v1277_v46 }
 0xd52   :  { %v3481_v51 = vadd.f32 %v1283_v49, %v1282_v50 }
 0xd54   :  { %1286 = vrot.lane.b32.xlu1 %v3481_v51, %s3153_s3 }
 0xd67   :  { %v1362_v52 = vpop.permute.xlu0 %1361 }
 0xd68   :  { %2731 = vmatmul.mubr.msk.f32.vlgmr.msra.gmra.mrb[14].mxu0 %vm63_vm1, %v1362_v52 }
 0xd69   :  { %2941 = vmatpush3.bf16.msra.mxu0 %v3278_v30  ;;  %2752 = vmatprep.mubr.msk.f32.mxu0 %vm3150_vm0, %v3151_v1 }
 0xd6a   :  { %2942 = vmatprep.subr.bf16.mxu0 %v3149_v0 }
 0xd6d   :  { %2944 = vmatpush3.bf16.msra.mxu0 %v3291_v34 }
 0xd6e   :  { %2951 = vmatprep.subr.bf16.mxu0 %v3149_v0 }
 0xdc6   :  { %v1287_v53 = vpop.permute.xlu1 %1286 }
 0xdc7   :  { %2720 = vmatmul.mubr.msk.f32.vlgmr.msra.gmra.mrb[12].mxu1 %vm63_vm1, %v1287_v53 }
 0xdc8   :  { %2935 = vmatpush3.bf16.msra.mxu1 %v3232_v5  ;;  %2741 = vmatprep.mubr.msk.f32.mxu1 %vm3150_vm0, %v3151_v1 }
 0xdc9   :  { %2936 = vmatprep.subr.bf16.mxu1 %v3149_v0 }
 0xdcc   :  { %2938 = vmatpush3.bf16.msra.mxu1 %v3242_v8 }
 0xdcd   :  { %2945 = vmatprep.subr.bf16.mxu1 %v3149_v0 }
 0xdcf   :  { %2742 = vmatmul.mubr.msk.f32.vlgmr.msra.gmra.mrb[14].mxu1 %vm63_vm1, %v1287_v53 }
 0xdd0   :  { %2947 = vmatpush3.bf16.msra.mxu1 %v3267_v26  ;;  %2763 = vmatprep.mubr.msk.f32.mxu1 %vm3150_vm0, %v3151_v1 }
 0xdd1   :  { %2948 = vmatprep.subr.bf16.mxu1 %v3149_v0 }
 0xdd4   :  { %2950 = vmatpush3.bf16.msra.mxu1 %v3287_v33 }
 0xdd5   :  { %2957 = vmatprep.subr.bf16.mxu1 %v3149_v0 }
 0xe3b   :  { %v1431_v54 = vpop.f32.mrb[14].mxu0 }
 0xe3c   :  { %v1442_v55 = vadd.f32 %v1431_v54, %v3314_v44  ;;  %v2732_v56 = vpop.f32.mrb[15].mxu0 }
 0xe3e   :  { %1444 = vrot.lane.b32.xlu0 %v1442_v55, %s3152_s11 }
 0xe9a   :  { %v1356_v57 = vpop.f32.mrb[12].mxu1 }
 0xe9b   :  { %v1357_v58 = vadd.f32 %v3335_v47, %v1356_v57  ;;  %v2721_v59 = vpop.f32.mrb[13].mxu1 }
 0xe9c   :  { %v2429_v59 = vld [vmem:[%s3634_s0 + $0xc] sm:$0x3] }
 0xe9d   :  { %v1435_v60 = vadd.f32 %v1431_v54, %v1357_v58 }
 0xe9f   :  { %v2422_v61 = vmul.f32 -1.442695, %v1435_v60 }
 0xea1   :  { %3056 = vpow2.f32 %v2422_v61 }
 0xea2   :  { %v1530_v62 = vpop.f32.mrb[14].mxu1 }
 0xea3   :  { %v1541_v63 = vadd.f32 %v1530_v62, %v3250_v9  ;;  %v2743_v2 = vpop.f32.mrb[15].mxu1  ;;  %v1534_v12 = vadd.f32 %v2423_v11, %v1530_v62 }
 0xea5   :  { %1543 = vrot.lane.b32.xlu1 %v1541_v63, %s3152_s11  ;;  %v2425_v13 = vmul.f32 -1.442695, %v1534_v12 }
 0xeab   :  { %v3057_v3 = vpop.eup %3056 }
 0xeac   :  { %v1439_v4 = vadd.f32 1.0, %v3057_v3 }
 0xeae   :  { %3058 = vrcp.f32 %v1439_v4 }
 0xeaf   :  { %3060 = vpow2.f32 %v2425_v13 }
 0xeb0   :  { %v1445_v7 = vpop.permute.xlu0 %1444 }
 0xeb8   :  { %v3059_v6 = vpop.eup %3058 }
 0xeb9   :  { %v1447_v10 = vmul.f32 %v3059_v6, %v1445_v7  ;;  %v3061_v14 = vpop.eup %3060  ;;  %v1454_v25 = vsub.f32 1.0, %v3059_v6  ;;  %v1460_v28 = vmul.f32 %v3059_v6, %v3476_v45 }
 0xeba   :  { %v1538_v15 = vadd.f32 1.0, %v3061_v14 }
 0xebb   :  { %1449 = vrot.lane.b32.xlu0 %v1447_v10, %s3152_s11 }
 0xebc   :  { %3062 = vrcp.f32 %v1538_v15 }
 0xec6   :  { %v3063_v16 = vpop.eup %3062 }
 0xec7   :  { %v1553_v32 = vsub.f32 1.0, %v3063_v16  ;;  %v1559_v36 = vmul.f32 %v3063_v16, %v3481_v51 }
 0xf17   :  { %v1544_v17 = vpop.permute.xlu1 %1543 }
 0xf18   :  { %v1546_v18 = vmul.f32 %v3063_v16, %v1544_v17 }
 0xf1a   :  { %1548 = vrot.lane.b32.xlu1 %v1546_v18, %s3152_s11 }
 0xf2d   :  { %v1450_v19 = vpop.permute.xlu0 %1449 }
 0xf2e   :  { %v1452_v20 = vadd.f32 %v1450_v19, %v1357_v58 }
 0xf30   :  { %3064 = vtanh.f32 %v1452_v20 }
 0xf3a   :  { %v3065_v21 = vpop.eup %3064 }
 0xf3b   :  { %1456 = vrot.lane.b32.xlu0 %v3065_v21, %s3153_s3 }
 0xf8c   :  { %v1549_v22 = vpop.permute.xlu1 %1548 }
 0xf8d   :  { %v1551_v23 = vadd.f32 %v2423_v11, %v1549_v22 }
 0xf8f   :  { %3066 = vtanh.f32 %v1551_v23 }
 0xf99   :  { %v3067_v24 = vpop.eup %3066 }
 0xf9a   :  { %1555 = vrot.lane.b32.xlu1 %v3067_v24, %s3153_s3 }
 0xfad   :  { %v1457_v27 = vpop.permute.xlu0 %1456 }
 0xfae   :  { %v1459_v29 = vmul.f32 %v1457_v27, %v1454_v25 }
 0xfb0   :  { %v3519_v31 = vadd.f32 %v1460_v28, %v1459_v29 }
 0xfb2   :  { %1637 = vrot.lane.b32.xlu0 %v3519_v31, %s3153_s3 }
0x100c   :  { %v1556_v35 = vpop.permute.xlu1 %1555 }
0x100d   :  { %v1558_v37 = vmul.f32 %v1556_v35, %v1553_v32 }
0x100f   :  { %v3524_v38 = vadd.f32 %v1559_v36, %v1558_v37 }
0x1011   :  { %1562 = vrot.lane.b32.xlu1 %v3524_v38, %s3153_s3 }
0x1024   :  { %v1638_v39 = vpop.permute.xlu0 %1637 }
0x1025   :  { %2764 = vmatmul.mubr.msk.f32.vlgmr.msra.gmra.mrb[16].mxu1 %vm63_vm1, %v1638_v39 }
0x1026   :  { %2959 = vmatpush3.bf16.msra.mxu1 %v3278_v30  ;;  %2785 = vmatprep.mubr.msk.f32.mxu1 %vm3150_vm0, %v3151_v1 }
0x1027   :  { %2960 = vmatprep.subr.bf16.mxu1 %v3149_v0 }
0x102a   :  { %2962 = vmatpush3.bf16.msra.mxu1 %v3291_v34 }
0x102b   :  { %2969 = vmatprep.subr.bf16.mxu1 %v3149_v0 }
0x1083   :  { %v1563_v40 = vpop.permute.xlu1 %1562 }
0x1084   :  { %2753 = vmatmul.mubr.msk.f32.vlgmr.msra.gmra.mrb[16].mxu0 %vm63_vm1, %v1563_v40 }
0x1085   :  { %2953 = vmatpush3.bf16.msra.mxu0 %v3232_v5  ;;  %2774 = vmatprep.mubr.msk.f32.mxu0 %vm3150_vm0, %v3151_v1 }
0x1086   :  { %2954 = vmatprep.subr.bf16.mxu0 %v3149_v0 }
0x1089   :  { %2956 = vmatpush3.bf16.msra.mxu0 %v3242_v8 }
0x108a   :  { %2963 = vmatprep.subr.bf16.mxu0 %v3149_v0 }
0x108c   :  { %2775 = vmatmul.mubr.msk.f32.vlgmr.msra.gmra.mrb[18].mxu0 %vm63_vm1, %v1563_v40  ;;  %v2435_v40 = vld [vmem:[%s3634_s0 + $0xe] sm:$0x3] }
0x108d   :  { %2965 = vmatpush3.bf16.msra.mxu0 %v3267_v26  ;;  %2796 = vmatprep.mubr.msk.f32.mxu0 %vm3150_vm0, %v3151_v1 }
0x108e   :  { %2966 = vmatprep.subr.bf16.mxu0 %v3149_v0 }
0x1091   :  { %2968 = vmatpush3.bf16.msra.mxu0 %v3287_v33 }
0x1092   :  { %2975 = vmatprep.subr.bf16.mxu0 %v3149_v0 }
0x10f8   :  { %v1707_v41 = vpop.f32.mrb[16].mxu1 }
0x10f9   :  { %v1718_v42 = vadd.f32 %v1707_v41, %v3314_v44  ;;  %v2765_v43 = vpop.f32.mrb[17].mxu1 }
0x10fb   :  { %1720 = vrot.lane.b32.xlu0 %v1718_v42, %s3152_s11 }
0x1157   :  { %v1632_v45 = vpop.f32.mrb[16].mxu0 }
0x1158   :  { %v1633_v46 = vadd.f32 %v3335_v47, %v1632_v45  ;;  %v2754_v48 = vpop.f32.mrb[17].mxu0 }
0x115a   :  { %v1711_v49 = vadd.f32 %v1707_v41, %v1633_v46 }
0x115c   :  { %v2428_v50 = vmul.f32 -1.442695, %v1711_v49 }
0x115e   :  { %3068 = vpow2.f32 %v2428_v50 }
0x115f   :  { %v1806_v51 = vpop.f32.mrb[18].mxu0 }
0x1160   :  { %v1817_v52 = vadd.f32 %v1806_v51, %v3250_v9  ;;  %v2776_v53 = vpop.f32.mrb[19].mxu0  ;;  %v1810_v60 = vadd.f32 %v2429_v59, %v1806_v51 }
0x1162   :  { %1819 = vrot.lane.b32.xlu1 %v1817_v52, %s3152_s11  ;;  %v2431_v61 = vmul.f32 -1.442695, %v1810_v60 }
0x1168   :  { %v3069_v54 = vpop.eup %3068 }
0x1169   :  { %v1715_v55 = vadd.f32 1.0, %v3069_v54 }
0x116b   :  { %3070 = vrcp.f32 %v1715_v55 }
0x116c   :  { %3072 = vpow2.f32 %v2431_v61 }
0x116d   :  { %v1721_v57 = vpop.permute.xlu0 %1720 }
0x1175   :  { %v3071_v56 = vpop.eup %3070 }
0x1176   :  { %v1723_v58 = vmul.f32 %v3071_v56, %v1721_v57  ;;  %v3073_v62 = vpop.eup %3072  ;;  %v1730_v14 = vsub.f32 1.0, %v3071_v56  ;;  %v1736_v16 = vmul.f32 %v3071_v56, %v3519_v31 }
0x1177   :  { %v1814_v63 = vadd.f32 1.0, %v3073_v62 }
0x1178   :  { %1725 = vrot.lane.b32.xlu0 %v1723_v58, %s3152_s11 }
0x1179   :  { %3074 = vrcp.f32 %v1814_v63 }
0x1183   :  { %v3075_v2 = vpop.eup %3074 }
0x1184   :  { %v1829_v19 = vsub.f32 1.0, %v3075_v2  ;;  %v1835_v21 = vmul.f32 %v3075_v2, %v3524_v38 }
0x11d4   :  { %v1820_v3 = vpop.permute.xlu1 %1819 }
0x11d5   :  { %v1822_v4 = vmul.f32 %v3075_v2, %v1820_v3 }
0x11d7   :  { %1824 = vrot.lane.b32.xlu1 %v1822_v4, %s3152_s11 }
0x11ea   :  { %v1726_v6 = vpop.permute.xlu0 %1725 }
0x11eb   :  { %v1728_v7 = vadd.f32 %v1726_v6, %v1633_v46 }
0x11ed   :  { %3076 = vtanh.f32 %v1728_v7 }
0x11f7   :  { %v3077_v10 = vpop.eup %3076 }
0x11f8   :  { %1732 = vrot.lane.b32.xlu0 %v3077_v10, %s3153_s3 }
0x1249   :  { %v1825_v11 = vpop.permute.xlu1 %1824 }
0x124a   :  { %v1827_v12 = vadd.f32 %v2429_v59, %v1825_v11 }
0x124c   :  { %3078 = vtanh.f32 %v1827_v12 }
0x1256   :  { %v3079_v13 = vpop.eup %3078 }
0x1257   :  { %1831 = vrot.lane.b32.xlu1 %v3079_v13, %s3153_s3 }
0x126a   :  { %v1733_v15 = vpop.permute.xlu0 %1732 }
0x126b   :  { %v1735_v17 = vmul.f32 %v1733_v15, %v1730_v14 }
0x126d   :  { %v3562_v18 = vadd.f32 %v1736_v16, %v1735_v17 }
0x126f   :  { %1913 = vrot.lane.b32.xlu0 %v3562_v18, %s3153_s3 }
0x12c9   :  { %v1832_v20 = vpop.permute.xlu1 %1831 }
0x12ca   :  { %v1834_v22 = vmul.f32 %v1832_v20, %v1829_v19 }
0x12cc   :  { %v3567_v23 = vadd.f32 %v1835_v21, %v1834_v22  ;;  %v2290_v21 = vld [vmem:[#allocation2] sm:$0xff]  ;;  %v2291_v22 = vld [vmem:[#allocation2 + $0x8] sm:$0xff] }
0x12ce   :  { %1838 = vrot.lane.b32.xlu1 %v3567_v23, %s3153_s3 }
0x12e1   :  { %v1914_v24 = vpop.permute.xlu0 %1913 }
0x12e2   :  { %2797 = vmatmul.mubr.msk.f32.vlgmr.msra.gmra.mrb[20].mxu0 %vm63_vm1, %v1914_v24  ;;  %v2988_v24 = vpack.c.bf16 %v2291_v22, %v2290_v21 }
0x12e3   :  { %2977 = vmatpush3.bf16.msra.mxu0 %v3278_v30  ;;  %2818 = vmatprep.mubr.msk.f32.mxu0 %vm3150_vm0, %v3151_v1 }
0x12e4   :  { %2978 = vmatprep.subr.bf16.mxu0 %v3149_v0 }
0x12e7   :  { %2980 = vmatpush3.bf16.msra.mxu0 %v3291_v34 }
0x12e8   :  { %2987 = vmatprep.subr.bf16.mxu0 %v3149_v0 }
0x1340   :  { %v1839_v25 = vpop.permute.xlu1 %1838 }
0x1341   :  { %2786 = vmatmul.mubr.msk.f32.vlgmr.msra.gmra.mrb[18].mxu1 %vm63_vm1, %v1839_v25 }
0x1342   :  { %2971 = vmatpush3.bf16.msra.mxu1 %v3232_v5  ;;  %2807 = vmatprep.mubr.msk.f32.mxu1 %vm3150_vm0, %v3151_v1 }
0x1343   :  { %2972 = vmatprep.subr.bf16.mxu1 %v3149_v0 }
0x1346   :  { %2974 = vmatpush3.bf16.msra.mxu1 %v3242_v8 }
0x1347   :  { %2981 = vmatprep.subr.bf16.mxu1 %v3149_v0 }
0x1349   :  { %2808 = vmatmul.mubr.msk.f32.vlgmr.msra.gmra.mrb[20].mxu1 %vm63_vm1, %v1839_v25 }
0x134a   :  { %2983 = vmatpush3.bf16.msra.mxu1 %v3267_v26  ;;  %2829 = vmatprep.mubr.msk.f32.mxu1 %vm3150_vm0, %v3151_v1 }
0x134b   :  { %2984 = vmatprep.subr.bf16.mxu1 %v3149_v0 }
0x134e   :  { %2986 = vmatpush3.bf16.msra.mxu1 %v3287_v33 }
0x13b5   :  { %v1983_v5 = vpop.f32.mrb[20].mxu0 }
0x13b6   :  { %v1994_v30 = vadd.f32 %v1983_v5, %v3314_v44  ;;  %v2798_v34 = vpop.f32.mrb[21].mxu0 }
0x13b8   :  { %1996 = vrot.lane.b32.xlu0 %v1994_v30, %s3152_s11 }
0x1414   :  { %v1908_v8 = vpop.f32.mrb[18].mxu1 }
0x1415   :  { %v1909_v27 = vadd.f32 %v3335_v47, %v1908_v8  ;;  %v2787_v28 = vpop.f32.mrb[19].mxu1 }
0x1417   :  { %v1987_v29 = vadd.f32 %v1983_v5, %v1909_v27 }
0x1419   :  { %v2434_v31 = vmul.f32 -1.442695, %v1987_v29 }
0x141b   :  { %3080 = vpow2.f32 %v2434_v31  ;;  %v2441_v31 = vld [vmem:[%s3642_s8] ss:$0 sm:$0xff] }
0x141c   :  { %v2082_v26 = vpop.f32.mrb[20].mxu1 }
0x141d   :  { %v2093_v32 = vadd.f32 %v2082_v26, %v3250_v9  ;;  %v2809_v35 = vpop.f32.mrb[21].mxu1  ;;  %v2086_v41 = vadd.f32 %v2435_v40, %v2082_v26 }
0x141f   :  { %2095 = vrot.lane.b32.xlu1 %v2093_v32, %s3152_s11  ;;  %v2437_v42 = vmul.f32 -1.442695, %v2086_v41 }
0x1425   :  { %v3081_v33 = vpop.eup %3080 }
0x1426   :  { %v1991_v36 = vadd.f32 1.0, %v3081_v33 }
0x1428   :  { %3082 = vrcp.f32 %v1991_v36 }
0x1429   :  { %3084 = vpow2.f32 %v2437_v42 }
0x142a   :  { %v1997_v38 = vpop.permute.xlu0 %1996 }
0x1432   :  { %v3083_v37 = vpop.eup %3082 }
0x1433   :  { %v1999_v39 = vmul.f32 %v3083_v37, %v1997_v38  ;;  %v3085_v43 = vpop.eup %3084  ;;  %v2006_v55 = vsub.f32 1.0, %v3083_v37  ;;  %v2012_v57 = vmul.f32 %v3083_v37, %v3562_v18 }
0x1434   :  { %v2090_v9 = vadd.f32 1.0, %v3085_v43 }
0x1435   :  { %2001 = vrot.lane.b32.xlu0 %v1999_v39, %s3152_s11 }
0x1436   :  { %3086 = vrcp.f32 %v2090_v9 }
0x1440   :  { %v3087_v45 = vpop.eup %3086 }
0x1441   :  { %v2105_v60 = vsub.f32 1.0, %v3087_v45  ;;  %v2111_v62 = vmul.f32 %v3087_v45, %v3567_v23  ;;  %v2292_v23 = vld [vmem:[#allocation2 + $0x10] sm:$0xff] }
0x1491   :  { %v2096_v46 = vpop.permute.xlu1 %2095 }
0x1492   :  { %v2098_v48 = vmul.f32 %v3087_v45, %v2096_v46 }
0x1494   :  { %2100 = vrot.lane.b32.xlu1 %v2098_v48, %s3152_s11 }
0x14a7   :  { %v2002_v49 = vpop.permute.xlu0 %2001 }
0x14a8   :  { %v2004_v50 = vadd.f32 %v2002_v49, %v1909_v27 }
0x14aa   :  { %3088 = vtanh.f32 %v2004_v50 }
0x14b4   :  { %v3089_v51 = vpop.eup %3088 }
0x14b5   :  { %2008 = vrot.lane.b32.xlu0 %v3089_v51, %s3153_s3 }
0x1506   :  { %v2101_v52 = vpop.permute.xlu1 %2100 }
0x1507   :  { %v2103_v53 = vadd.f32 %v2435_v40, %v2101_v52 }
0x1509   :  { %3090 = vtanh.f32 %v2103_v53 }
0x1513   :  { %v3091_v54 = vpop.eup %3090 }
0x1514   :  { %2107 = vrot.lane.b32.xlu1 %v3091_v54, %s3153_s3 }
0x1527   :  { %v2009_v56 = vpop.permute.xlu0 %2008 }
0x1528   :  { %v2011_v58 = vmul.f32 %v2009_v56, %v2006_v55 }
0x152a   :  { %v2013_v59 = vadd.f32 %v2012_v57, %v2011_v58 }
0x152c   :  { %2189 = vrot.lane.b32.xlu0 %v2013_v59, %s3153_s3 }
0x1586   :  { %v2108_v61 = vpop.permute.xlu1 %2107 }
0x1587   :  { %v2110_v63 = vmul.f32 %v2108_v61, %v2105_v60 }
0x1589   :  { %v2112_v2 = vadd.f32 %v2111_v62, %v2110_v63 }
0x158b   :  { %2114 = vrot.lane.b32.xlu1 %v2112_v2, %s3153_s3 }
0x159e   :  { %v2190_v3 = vpop.permute.xlu0 %2189 }
0x159f   :  { %2830 = vmatmul.mubr.msk.f32.vlgmr.msra.gmra.mrb[22].mxu1 %vm63_vm1, %v2190_v3 }
0x15fd   :  { %v2115_v4 = vpop.permute.xlu1 %2114 }
0x15fe   :  { %2819 = vmatmul.mubr.msk.f32.vlgmr.msra.gmra.mrb[22].mxu0 %vm63_vm1, %v2115_v4 }
0x15ff   :  { %2840 = vmatprep.mubr.msk.f32.mxu0 %vm3150_vm0, %v3151_v1  ;;  %2989 = vmatpush3.bf16.msra.mxu0 %v2988_v24 }
0x1600   :  { %2990 = vmatprep.subr.bf16.mxu0 %v3149_v0 }
0x1672   :  { %v2259_v6 = vpop.f32.mrb[22].mxu1 }
0x1673   :  { %v2270_v7 = vadd.f32 %v2259_v6, %v3314_v44  ;;  %v2831_v10 = vpop.f32.mrb[23].mxu1 }
0x1675   :  { %2272 = vrot.lane.b32.xlu0 %v2270_v7, %s3152_s11 }
0x16d1   :  { %v2184_v11 = vpop.f32.mrb[22].mxu0 }
0x16d2   :  { %v2185_v12 = vadd.f32 %v3335_v47, %v2184_v11  ;;  %v2820_v13 = vpop.f32.mrb[23].mxu0  ;;  %v2293_v47 = vld [vmem:[#allocation2 + $0x18] sm:$0xff] }
0x16d3   :  { %v2991_v25 = vpack.c.bf16 %v2293_v47, %v2292_v23 }
0x16d4   :  { %v2263_v14 = vadd.f32 %v2259_v6, %v2185_v12 }
0x16d5   :  { %2992 = vmatpush3.bf16.msra.mxu0 %v2991_v25 }
0x16d6   :  { %v2440_v15 = vmul.f32 -1.442695, %v2263_v14 }
0x16d8   :  { %3092 = vpow2.f32 %v2440_v15 }
0x16e2   :  { %v3093_v16 = vpop.eup %3092 }
0x16e3   :  { %v2267_v17 = vadd.f32 1.0, %v3093_v16 }
0x16e5   :  { %3094 = vrcp.f32 %v2267_v17 }
0x16e7   :  { %v2273_v19 = vpop.permute.xlu0 %2272 }
0x16ef   :  { %v3095_v18 = vpop.eup %3094 }
0x16f0   :  { %v2275_v20 = vmul.f32 %v3095_v18, %v2273_v19  ;;  %v2282_v30 = vsub.f32 1.0, %v3095_v18  ;;  %v2288_v8 = vmul.f32 %v3095_v18, %v2013_v59 }
0x16f2   :  { %2277 = vrot.lane.b32.xlu1 %v2275_v20, %s3152_s11 }
0x1764   :  { %v2278_v1 = vpop.permute.xlu1 %2277 }
0x1765   :  { %v2280_v44 = vadd.f32 %v2278_v1, %v2185_v12 }
0x1767   :  { %3096 = vtanh.f32 %v2280_v44 }
0x1771   :  { %v3097_v5 = vpop.eup %3096 }
0x1772   :  { %2284 = vrot.lane.b32.xlu0 %v3097_v5, %s3153_s3 }
0x17e4   :  { %v2285_v34 = vpop.permute.xlu0 %2284 }
0x17e5   :  { %v2287_v27 = vmul.f32 %v2285_v34, %v2282_v30 }
0x17e7   :  { %v2289_v28 = vadd.f32 %v2288_v8, %v2287_v27 }
0x17e9   :  { %2302 = vrot.lane.b32.xlu1 %v2289_v28, %s3153_s3 }
0x185b   :  { %v2303_v29 = vpop.permute.xlu1 %2302 }
0x185c   :  { %2841 = vmatmul.mubr.msk.f32.vlgmr.msra.gmra.mrb[24].mxu0 %vm63_vm1, %v2303_v29 }
0x192f   :  { %v2372_v26 = vpop.f32.mrb[24].mxu0 }
0x1930   :  { %v2373_v0 = vadd.f32 %v2441_v31, %v2372_v26  ;;  %v2842_v32 = vpop.f32.mrb[25].mxu0 }
0x1932   :  { %v2376_v35 = vmax.f32 %v2373_v0, 0.0 }
0x1934   :  { %2377 = vst [vmem:[#allocation5] sm:$0x3] %v2376_v35 }
0x1935   :  { %3131 = shalt.err (!%p3128_p12)
}
0x1936   :  { %s3132_s7 = scalar_lea.hbm %s3643_s9, 32 }
0x1937   :  { %p3133_p13 = scmp.ne.s32.totalorder %s3643_s9, %s3132_s7  ;;  %p3136_p0 = scmp.lt.u32.totalorder %s3132_s7, %s3643_s9 }
0x1939   :  { %p3138_p1 = pnand %p3136_p0, %p3133_p13 }
0x193b   :  { %3141 = shalt.err (!%p3138_p1)
}
0x193c   :  { %2387 = dma.vmem_to_hbm [thread:$0]  %s2385_s21, 32, %s3643_s9, [#allocation4]  }
0x193d   :  { %3144 = dma.done.wait [#allocation4], 32  }
0x193e   :  { %3145 = vsyncadd [#allocation4], 4294967264 }
0x193f   :  { %2391 = vsyncpa [#allocation3], 1 }
0x1940   :  { %2392 = vsyncpa [#allocation4], 1 }

</bundles_post_ra>
